<compile_context>
chip_gen: v7x
topology: tpu7x:2x2x1
jax: 0.10.0
libtpu: 0.0.40
codegen_flags: <defaults>
</compile_context>

<pallas_src>
import numpy as np
import jax
import jax.numpy as jnp
from jax.experimental import pallas as pl
from jax.experimental.pallas import tpu as pltpu


# ------------------------------------------------------------------ constant matrices

def _dct8_matrix():
    # D[p, m] = cos(pi*(2m+1)p/16) * c(p),  c(0)=sqrt(1/8), c(p>0)=1/2
    p = np.arange(8)
    m = np.arange(8)
    d = np.cos(np.pi * (2 * m[None, :] + 1) * p[:, None] / 16.0)
    c = np.where(p == 0, np.sqrt(1.0 / 8.0), 0.5)
    return d * c[:, None]


def _fused_block_matrix(k=1):
    # 8x8 A such that per 8x8 block: IDCT(mask * DCT(X)) == A @ X @ A
    # (the LPF mask is separable u u^T, so A = D^T diag(u) D).
    lpf_list = [8, 6, 5, 4, 3, 2]
    r = lpf_list[k]
    d = _dct8_matrix()
    u = np.zeros((8,), np.float64)
    u[:r] = 1.0
    return (d.T @ (u[:, None] * d)).astype(np.float32)


def _block_diag(a, n):
    # (n, n) block-diagonal kron(I, A); n is a multiple of 8.
    return np.kron(np.eye(n // 8, dtype=np.float32), a).astype(np.float32)


def _pool2_rows_matrix(n):
    # (n//2, n) exact 2x average-pool matrix (rows of 0.5, 0.5).
    m = np.zeros((n // 2, n), np.float32)
    idx = np.arange(n // 2)
    m[idx, 2 * idx] = 0.5
    m[idx, 2 * idx + 1] = 0.5
    return m


def _upsample_ac_matrix(n_in, n_out):
    # (n_out, n_in) align-corners bilinear interpolation matrix
    # (== nn.UpsamplingBilinear2d along one axis).
    u = np.zeros((n_out, n_in), np.float64)
    if n_in == 1:
        u[:, 0] = 1.0
        return u.astype(np.float32)
    src = np.arange(n_out) * (n_in - 1) / (n_out - 1)
    i0 = np.clip(np.floor(src).astype(np.int64), 0, n_in - 1)
    i1 = np.clip(i0 + 1, 0, n_in - 1)
    f = src - i0
    rows = np.arange(n_out)
    np.add.at(u, (rows, i0), 1.0 - f)
    np.add.at(u, (rows, i1), f)
    return u.astype(np.float32)


# Colour coefficients with the (x+1)/2 input shift and *2-1 output shift folded in.
_Y_R, _Y_G, _Y_B = 0.299 * 0.5, 0.587 * 0.5, 0.114 * 0.5              # + 0.5
_CB_R, _CB_G, _CB_B = -0.1687 * 0.5, -0.3313 * 0.5, 0.5 * 0.5          # + 0.5
_CR_R, _CR_G, _CR_B = 0.5 * 0.5, -0.4187 * 0.5, -0.0813 * 0.5          # + 0.5
_R_CR = 2.0 * 1.402
_G_CB = 2.0 * 0.344136286
_G_CR = 2.0 * 0.714136286
_B_CB = 2.0 * 1.772
_R_OFF = -(1.402 + 1.0)
_G_OFF = (0.344136286 + 0.714136286) - 1.0
_B_OFF = -(1.772 + 1.0)


# ------------------------------------------------------------------ tile pickers

def _row_tile(n, target, step=8):
    # largest multiple-of-`step` divisor of n that is <= target (or n itself if small).
    if n <= target:
        return n
    best, t = step, step
    while t <= target:
        if n % t == 0:
            best = t
        t += step
    return best


def _col_tile(n, target):
    # lane (last) dim: multiple of 128 or the full dim.
    if n <= target:
        return n
    best, t = None, 128
    while t <= target:
        if n % t == 0:
            best = t
        t += 128
    return best if best is not None else n


def _colour_row_tile(h, w):
    target = max(16, min(512, (128 * 1024) // max(w, 1)))
    return _row_tile(h, target, step=16)   # multiple of 16 so 2x2 pooling pairs in-tile


def _dct_tile_targets():
    # Per-generation contraction-depth targets for the fused DCT matmul launches.
    try:
        kind = jax.devices()[0].device_kind.lower()
    except Exception:
        kind = ""
    if "v5e" in kind or "v5 lite" in kind or "v5lite" in kind:
        return 128, 128    # 4x128^2 MXU already saturated; halves kron(I,A) zero-FLOPs
    if "v6" in kind:
        return 512, 512    # amortize ~0.35us/step overhead; still HBM-bound, ~8 MiB VMEM
    return 256, 256        # v7x & unknown: 64 MiB VMEM / ~311 FLOP/B crossover -> stay modest


# ------------------------------------------------------------------ Pallas kernels

def _rgb_to_ycbcr_pool_kernel(x_ref, pr_ref, pc_ref, y_ref, cbcr_ref):
    r = x_ref[0, 0]
    g = x_ref[0, 1]
    b = x_ref[0, 2]
    # (x+1)/2 input shift folded into coefficients; Y/Cb/Cr each a single FMA chain.
    y_ref[0] = _Y_R * r + _Y_G * g + _Y_B * b + 0.5
    cb = _CB_R * r + _CB_G * g + _CB_B * b + 0.5
    cr = _CR_R * r + _CR_G * g + _CR_B * b + 0.5
    # Fused 2x2 average pool: exact 0.25-weighted sums expressed as two small MXU
    # matmuls (pooling weights sum to 1, so the +0.5 offsets pass through unchanged).
    pr = pr_ref[...]   # (th//2, th)
    pc = pc_ref[...]   # (W, W//2)
    cbcr_ref[0, 0] = jnp.dot(jnp.dot(pr, cb, preferred_element_type=jnp.float32),
                             pc, preferred_element_type=jnp.float32)
    cbcr_ref[0, 1] = jnp.dot(jnp.dot(pr, cr, preferred_element_type=jnp.float32),
                             pc, preferred_element_type=jnp.float32)


def _dct_lpf_idct_kernel(x_ref, ar_ref, ac_ref, o_ref):
    # Fused block-DCT -> low-pass -> block-IDCT on an image tile:
    #   out = kron(I, A) @ X @ kron(I, A)   (two MXU matmuls, f32 accumulation)
    t = jnp.dot(ar_ref[...], x_ref[...], preferred_element_type=jnp.float32)
    o_ref[...] = jnp.dot(t, ac_ref[...], preferred_element_type=jnp.float32)


def _ycbcr_up_to_rgb_kernel(y_ref, cbcr_ref, ur_ref, uc_ref, o_ref):
    # x2 align-corners bilinear chroma upsample fused in as two matmuls per channel:
    #   cb_full_tile = U_r[tile rows] @ cb_half_plane @ U_c^T
    ur = ur_ref[...]   # (th, Hs)
    uc = uc_ref[...]   # (Ws, W)
    cb = jnp.dot(jnp.dot(ur, cbcr_ref[0, 0], preferred_element_type=jnp.float32),
                 uc, preferred_element_type=jnp.float32)
    cr = jnp.dot(jnp.dot(ur, cbcr_ref[0, 1], preferred_element_type=jnp.float32),
                 uc, preferred_element_type=jnp.float32)
    ty = 2.0 * y_ref[0]
    # *2 - 1 output shift folded into the coefficients / offsets.
    o_ref[0, 0] = ty + _R_CR * cr + _R_OFF
    o_ref[0, 1] = ty - _G_CB * cb - _G_CR * cr + _G_OFF
    o_ref[0, 2] = ty + _B_CB * cb + _B_OFF


# ------------------------------------------------------------------ kernel wrappers

def _rgb_to_ycbcr_pool(images):
    B, _, H, W = images.shape
    th = _colour_row_tile(H, W)
    pr = jnp.asarray(_pool2_rows_matrix(th))        # (th//2, th)
    pc = jnp.asarray(_pool2_rows_matrix(W).T)       # (W, W//2)
    y_shape = jax.ShapeDtypeStruct((B, H, W), jnp.float32)
    cbcr_shape = jax.ShapeDtypeStruct((B, 2, H // 2, W // 2), jnp.float32)
    return pl.pallas_call(
        _rgb_to_ycbcr_pool_kernel,
        out_shape=(y_shape, cbcr_shape),
        grid=(B, H // th),
        in_specs=[pl.BlockSpec((1, 3, th, W), lambda b, i: (b, 0, i, 0)),
                  pl.BlockSpec((th // 2, th), lambda b, i: (0, 0)),
                  pl.BlockSpec((W, W // 2), lambda b, i: (0, 0))],
        out_specs=(pl.BlockSpec((1, th, W), lambda b, i: (b, i, 0)),
                   pl.BlockSpec((1, 2, th // 2, W // 2), lambda b, i: (b, 0, i, 0))),
        compiler_params=pltpu.CompilerParams(
            dimension_semantics=("parallel", "parallel")),
    )(images, pr, pc)


def _dct_lpf_idct(x2d, a, row_target, col_target):
    # x2d: (R, W) image rows; R, W multiples of 8; 8x8 blocks aligned to the grid.
    R, W = x2d.shape
    Wp = W
    if W > col_target and W % 128 != 0:
        # Guard the full-width fallback: pad columns to a multiple of 128 so the
        # tw x tw weight (and MXU FLOPs) stay bounded.  Zero 8-col blocks are
        # independent under the block-diagonal weights and are sliced off below.
        Wp = ((W + 127) // 128) * 128
        x2d = jnp.pad(x2d, ((0, 0), (0, Wp - W)))
    th = _row_tile(R, row_target, step=8)
    tw = _col_tile(Wp, col_target)
    ar = jnp.asarray(_block_diag(a, th))
    ac = jnp.asarray(_block_diag(a, tw))
    out = pl.pallas_call(
        _dct_lpf_idct_kernel,
        out_shape=jax.ShapeDtypeStruct((R, Wp), jnp.float32),
        grid=(R // th, Wp // tw),
        in_specs=[pl.BlockSpec((th, tw), lambda i, j: (i, j)),
                  # Weight blocks are grid-invariant (index (0,0)); the pipeline only
                  # DMAs them once, the second buffer is at most ~2 MiB of dead VMEM.
                  pl.BlockSpec((th, th), lambda i, j: (0, 0)),
                  pl.BlockSpec((tw, tw), lambda i, j: (0, 0))],
        out_specs=pl.BlockSpec((th, tw), lambda i, j: (i, j)),
        compiler_params=pltpu.CompilerParams(
            dimension_semantics=("parallel", "parallel")),
    )(x2d, ar, ac)
    return out[:, :W] if Wp != W else out


def _ycbcr_up_to_rgb(y, cbcr_half):
    B, H, W = y.shape
    _, _, Hs, Ws = cbcr_half.shape
    th = _colour_row_tile(H, W)
    ur = jnp.asarray(_upsample_ac_matrix(Hs, H))      # (H, Hs)  row upsample
    uct = jnp.asarray(_upsample_ac_matrix(Ws, W).T)   # (Ws, W)  column upsample (transposed)
    # TODO(synk): for very large images the per-step (2,Hs,Ws) chroma plane + (Ws,W)
    #             upsample weight may need column tiling or a raised vmem_limit_bytes.
    return pl.pallas_call(
        _ycbcr_up_to_rgb_kernel,
        out_shape=jax.ShapeDtypeStruct((B, 3, H, W), jnp.float32),
        grid=(B, H // th),
        in_specs=[pl.BlockSpec((1, th, W), lambda b, i: (b, i, 0)),
                  pl.BlockSpec((1, 2, Hs, Ws), lambda b, i: (b, 0, 0, 0)),
                  pl.BlockSpec((th, Hs), lambda b, i: (i, 0)),
                  pl.BlockSpec((Ws, W), lambda b, i: (0, 0))],
        out_specs=pl.BlockSpec((1, 3, th, W), lambda b, i: (b, 0, i, 0)),
        compiler_params=pltpu.CompilerParams(
            dimension_semantics=("parallel", "parallel")),
    )(y, cbcr_half, ur, uct)


# ------------------------------------------------------------------ full forward

def dct_forward(images, k=1):
    """Equivalent of DCT(k).forward(images) for 3-channel NCHW input."""
    images = images.astype(jnp.float32)
    B, C, H, W = images.shape
    assert C == 3 and H % 16 == 0 and W % 16 == 0

    a = _fused_block_matrix(k)
    row_t, col_t = _dct_tile_targets()

    # encoder: RGB -> YCbCr with the 2x2 chroma subsampling fused into the kernel.
    y, cbcr_half = _rgb_to_ycbcr_pool(images)
    Hs, Ws = H // 2, W // 2

    # fused block-DCT -> low-pass -> inverse block-DCT directly on image layout.
    # Y and (Cb,Cr) each in one launch; chroma batch/channel axes fold into the row
    # axis (Hs is a multiple of 8, so 8-row blocks never straddle planes).
    y_rec = _dct_lpf_idct(y.reshape(B * H, W), a, row_t, col_t).reshape(B, H, W)
    cbcr_rec = _dct_lpf_idct(cbcr_half.reshape(B * 2 * Hs, Ws), a, row_t, col_t
                             ).reshape(B, 2, Hs, Ws)

    # decoder: x2 align-corners chroma upsample fused into the YCbCr -> RGB kernel.
    return _ycbcr_up_to_rgb(y_rec, cbcr_rec)


# ------------------------------------------------------------------ pure-JAX reference

def _upsample_bilinear_ac_x2(x):
    # nn.UpsamplingBilinear2d(scale_factor=2) == bilinear with align_corners=True
    B, C, H, W = x.shape
    Ho, Wo = 2 * H, 2 * W

    def coords(n_in, n_out):
        src = jnp.arange(n_out, dtype=jnp.float32) * (n_in - 1) / (n_out - 1)
        i0 = jnp.clip(jnp.floor(src).astype(jnp.int32), 0, n_in - 1)
        i1 = jnp.clip(i0 + 1, 0, n_in - 1)
        return i0, i1, src - i0.astype(jnp.float32)

    r0, r1, rf = coords(H, Ho)
    c0, c1, cf = coords(W, Wo)
    xr = (x[:, :, r0, :] * (1.0 - rf)[None, None, :, None]
          + x[:, :, r1, :] * rf[None, None, :, None])
    return (xr[:, :, :, c0] * (1.0 - cf)[None, None, None, :]
            + xr[:, :, :, c1] * cf[None, None, None, :])


def _reference_dct_forward(images, k=1):
    # Literal translation of the PyTorch module (blockify -> two matmuls -> mask).
    images = images.astype(jnp.float32)
    B, C, H, W = images.shape
    d = jnp.asarray(_dct8_matrix(), jnp.float32)
    w = jnp.einsum("pm,qn->pqmn", d, d).reshape(64, 64)       # W[p*8+q, m*8+n]
    lpf_list = [8, 6, 5, 4, 3, 2]
    r = lpf_list[k]
    mask = jnp.zeros((8, 8), jnp.float32).at[:r, :r].set(1.0).reshape(1, 64)

    def blockify(x):
        b, h, ww = x.shape
        return (x.reshape(b, h // 8, 8, ww // 8, 8)
                .transpose(0, 1, 3, 2, 4).reshape(-1, 64))

    def unblockify(xb, b, h, ww):
        return (xb.reshape(b, h // 8, ww // 8, 8, 8)
                .transpose(0, 1, 3, 2, 4).reshape(b, h, ww))

    def dct_lpf_idct(ch):
        b, h, ww = ch.shape
        coef = blockify(ch) @ w.T
        return unblockify((coef * mask) @ w, b, h, ww)

    img = (images + 1.0) * 0.5
    rr, gg, bb = img[:, 0], img[:, 1], img[:, 2]
    y = 0.299 * rr + 0.587 * gg + 0.114 * bb
    cb = -0.1687 * rr - 0.3313 * gg + 0.5 * bb + 0.5
    cr = 0.5 * rr - 0.4187 * gg - 0.0813 * bb + 0.5
    cb_s = cb.reshape(B, H // 2, 2, W // 2, 2).mean(axis=(2, 4))
    cr_s = cr.reshape(B, H // 2, 2, W // 2, 2).mean(axis=(2, 4))
    y_rec = dct_lpf_idct(y)
    cbcr = jnp.stack([dct_lpf_idct(cb_s), dct_lpf_idct(cr_s)], axis=1)
    cbcr = _upsample_bilinear_ac_x2(cbcr)
    cbv, crv = cbcr[:, 0] - 0.5, cbcr[:, 1] - 0.5
    out = jnp.stack([y_rec + 1.402 * crv,
                     y_rec - 0.344136286 * cbv - 0.714136286 * crv,
                     y_rec + 1.772 * cbv], axis=1)
    return out * 2.0 - 1.0


if __name__ == "__main__":
    key = jax.random.PRNGKey(0)
    x = jax.random.uniform(key, (2, 3, 32, 32), jnp.float32, minval=-1.0, maxval=1.0)
    out = jax.jit(dct_forward)(x)
    out = jax.block_until_ready(out)
    assert out.shape == (2, 3, 32, 32) and out.dtype == jnp.float32
    ref = _reference_dct_forward(x)
    err = float(jnp.max(jnp.abs(out - ref)))
    assert jnp.allclose(out, ref, atol=1e-3, rtol=1e-3), f"max abs err {err}"
    print("KERNEL_OK")
</pallas_src>

<mosaic_0001>
module attributes {stable_mosaic.version = 11 : i64} {
  func.func @_dct_lpf_idct_kernel(%arg0: i32, %arg1: i32, %arg2: memref<64x32xf32, #tpu.memory_space<vmem>>, %arg3: memref<64x64xf32, #tpu.memory_space<vmem>>, %arg4: memref<32x32xf32, #tpu.memory_space<vmem>>, %arg5: memref<64x32xf32, #tpu.memory_space<vmem>>) attributes {dimension_semantics = [#tpu.dimension_semantics<parallel>, #tpu.dimension_semantics<parallel>], iteration_bounds = array<i64: 1, 1>, scalar_prefetch = 0 : i64, scratch_operands = 0 : i64, tpu.core_type = #tpu.core_type<tc>, window_params = [{transform_indices = @transform_0, window_bounds = array<i64: 64, 32>}, {pipeline_mode = #tpu.pipeline_mode<synchronous>, transform_indices = @transform_1, window_bounds = array<i64: 64, 64>}, {pipeline_mode = #tpu.pipeline_mode<synchronous>, transform_indices = @transform_2, window_bounds = array<i64: 32, 32>}, {transform_indices = @transform_3, window_bounds = array<i64: 64, 32>}]} {
    %c0 = arith.constant 0 : index
    %c0_0 = arith.constant 0 : index
    %0 = vector.load %arg3[%c0, %c0_0] : memref<64x64xf32, #tpu.memory_space<vmem>>, vector<64x64xf32>
    %c0_1 = arith.constant 0 : index
    %c0_2 = arith.constant 0 : index
    %1 = vector.load %arg2[%c0_1, %c0_2] : memref<64x32xf32, #tpu.memory_space<vmem>>, vector<64x32xf32>
    %cst = arith.constant dense<0.000000e+00> : vector<64x32xf32>
    %2 = tpu.matmul %0, %1, %cst {dimension_numbers = #tpu.dot_dimension_numbers<[1], [0], [0], [1], [0, 0, 1, 1], [], []>} : vector<64x64xf32>, vector<64x32xf32>, vector<64x32xf32> -> vector<64x32xf32>
    %c0_3 = arith.constant 0 : index
    %c0_4 = arith.constant 0 : index
    %3 = vector.load %arg4[%c0_3, %c0_4] : memref<32x32xf32, #tpu.memory_space<vmem>>, vector<32x32xf32>
    %cst_5 = arith.constant dense<0.000000e+00> : vector<64x32xf32>
    %4 = tpu.matmul %2, %3, %cst_5 {dimension_numbers = #tpu.dot_dimension_numbers<[1], [0], [0], [1], [0, 0, 1, 1], [], []>} : vector<64x32xf32>, vector<32x32xf32>, vector<64x32xf32> -> vector<64x32xf32>
    %c0_6 = arith.constant 0 : index
    %c0_7 = arith.constant 0 : index
    %5 = vector.load %arg5[%c0_6, %c0_7] : memref<64x32xf32, #tpu.memory_space<vmem>>, vector<64x32xf32>
    tpu.vector_store %arg5[%c0_6, %c0_7], %4 {strides = array<i32>} : memref<64x32xf32, #tpu.memory_space<vmem>>, vector<64x32xf32>,
    return
  }
  func.func @transform_0(%arg0: i32, %arg1: i32) -> (i32, i32) {
    %c0_i32 = arith.constant 0 : i32
    return %arg0, %arg1 : i32, i32
  }
  func.func @transform_1(%arg0: i32, %arg1: i32) -> (i32, i32) {
    %c0_i32 = arith.constant 0 : i32
    %c0_i32_0 = arith.constant 0 : i32
    %c0_i32_1 = arith.constant 0 : i32
    return %c0_i32, %c0_i32_0 : i32, i32
  }
  func.func @transform_2(%arg0: i32, %arg1: i32) -> (i32, i32) {
    %c0_i32 = arith.constant 0 : i32
    %c0_i32_0 = arith.constant 0 : i32
    %c0_i32_1 = arith.constant 0 : i32
    return %c0_i32, %c0_i32_0 : i32, i32
  }
  func.func @transform_3(%arg0: i32, %arg1: i32) -> (i32, i32) {
    %c0_i32 = arith.constant 0 : i32
    return %arg0, %arg1 : i32, i32
  }
}

module attributes {stable_mosaic.version = 11 : i64} {
  func.func @_rgb_to_ycbcr_pool_kernel(%arg0: i32, %arg1: i32, %arg2: memref<1x3x32x32xf32, #tpu.memory_space<vmem>>, %arg3: memref<16x32xf32, #tpu.memory_space<vmem>>, %arg4: memref<32x16xf32, #tpu.memory_space<vmem>>, %arg5: memref<1x32x32xf32, #tpu.memory_space<vmem>>, %arg6: memref<1x2x16x16xf32, #tpu.memory_space<vmem>>) attributes {dimension_semantics = [#tpu.dimension_semantics<parallel>, #tpu.dimension_semantics<parallel>], iteration_bounds = array<i64: 2, 1>, scalar_prefetch = 0 : i64, scratch_operands = 0 : i64, tpu.core_type = #tpu.core_type<tc>, window_params = [{transform_indices = @transform_0, window_bounds = array<i64: 1, 3, 32, 32>}, {pipeline_mode = #tpu.pipeline_mode<synchronous>, transform_indices = @transform_1, window_bounds = array<i64: 16, 32>}, {pipeline_mode = #tpu.pipeline_mode<synchronous>, transform_indices = @transform_2, window_bounds = array<i64: 32, 16>}, {transform_indices = @transform_3, window_bounds = array<i64: 1, 32, 32>}, {transform_indices = @transform_4, window_bounds = array<i64: 1, 2, 16, 16>}]} {
    %c0 = arith.constant 0 : index
    %c0_0 = arith.constant 0 : index
    %c0_1 = arith.constant 0 : index
    %c0_2 = arith.constant 0 : index
    %0 = vector.load %arg2[%c0, %c0_0, %c0_1, %c0_2] : memref<1x3x32x32xf32, #tpu.memory_space<vmem>>, vector<1x1x32x32xf32>
    %1 = vector.shape_cast %0 : vector<1x1x32x32xf32> to vector<32x32xf32>
    %c0_3 = arith.constant 0 : index
    %c1 = arith.constant 1 : index
    %c0_4 = arith.constant 0 : index
    %c0_5 = arith.constant 0 : index
    %2 = vector.load %arg2[%c0_3, %c1, %c0_4, %c0_5] : memref<1x3x32x32xf32, #tpu.memory_space<vmem>>, vector<1x1x32x32xf32>
    %3 = vector.shape_cast %2 : vector<1x1x32x32xf32> to vector<32x32xf32>
    %c0_6 = arith.constant 0 : index
    %c2 = arith.constant 2 : index
    %c0_7 = arith.constant 0 : index
    %c0_8 = arith.constant 0 : index
    %4 = vector.load %arg2[%c0_6, %c2, %c0_7, %c0_8] : memref<1x3x32x32xf32, #tpu.memory_space<vmem>>, vector<1x1x32x32xf32>
    %5 = vector.shape_cast %4 : vector<1x1x32x32xf32> to vector<32x32xf32>
    %cst = arith.constant 1.495000e-01 : f32
    %6 = vector.broadcast %cst : f32 to vector<32x32xf32>
    %7 = arith.mulf %6, %1 : vector<32x32xf32>
    %cst_9 = arith.constant 2.935000e-01 : f32
    %8 = vector.broadcast %cst_9 : f32 to vector<32x32xf32>
    %9 = arith.mulf %8, %3 : vector<32x32xf32>
    %10 = arith.addf %7, %9 : vector<32x32xf32>
    %cst_10 = arith.constant 5.700000e-02 : f32
    %11 = vector.broadcast %cst_10 : f32 to vector<32x32xf32>
    %12 = arith.mulf %11, %5 : vector<32x32xf32>
    %13 = arith.addf %10, %12 : vector<32x32xf32>
    %cst_11 = arith.constant 5.000000e-01 : f32
    %14 = vector.broadcast %cst_11 : f32 to vector<32x32xf32>
    %15 = arith.addf %13, %14 : vector<32x32xf32>
    %c0_12 = arith.constant 0 : index
    %c0_13 = arith.constant 0 : index
    %c0_14 = arith.constant 0 : index
    %16 = vector.load %arg5[%c0_12, %c0_13, %c0_14] : memref<1x32x32xf32, #tpu.memory_space<vmem>>, vector<1x32x32xf32>
    %17 = vector.shape_cast %16 : vector<1x32x32xf32> to vector<32x32xf32>
    %18 = vector.shape_cast %15 : vector<32x32xf32> to vector<1x32x32xf32>
    tpu.vector_store %arg5[%c0_12, %c0_13, %c0_14], %18 {strides = array<i32>} : memref<1x32x32xf32, #tpu.memory_space<vmem>>, vector<1x32x32xf32>,
    %cst_15 = arith.constant -0.0843499973 : f32
    %19 = vector.broadcast %cst_15 : f32 to vector<32x32xf32>
    %20 = arith.mulf %19, %1 : vector<32x32xf32>
    %cst_16 = arith.constant -1.656500e-01 : f32
    %21 = vector.broadcast %cst_16 : f32 to vector<32x32xf32>
    %22 = arith.mulf %21, %3 : vector<32x32xf32>
    %23 = arith.addf %20, %22 : vector<32x32xf32>
    %cst_17 = arith.constant 2.500000e-01 : f32
    %24 = vector.broadcast %cst_17 : f32 to vector<32x32xf32>
    %25 = arith.mulf %24, %5 : vector<32x32xf32>
    %26 = arith.addf %23, %25 : vector<32x32xf32>
    %cst_18 = arith.constant 5.000000e-01 : f32
    %27 = vector.broadcast %cst_18 : f32 to vector<32x32xf32>
    %28 = arith.addf %26, %27 : vector<32x32xf32>
    %cst_19 = arith.constant 2.500000e-01 : f32
    %29 = vector.broadcast %cst_19 : f32 to vector<32x32xf32>
    %30 = arith.mulf %29, %1 : vector<32x32xf32>
    %cst_20 = arith.constant -2.093500e-01 : f32
    %31 = vector.broadcast %cst_20 : f32 to vector<32x32xf32>
    %32 = arith.mulf %31, %3 : vector<32x32xf32>
    %33 = arith.addf %30, %32 : vector<32x32xf32>
    %cst_21 = arith.constant -4.065000e-02 : f32
    %34 = vector.broadcast %cst_21 : f32 to vector<32x32xf32>
    %35 = arith.mulf %34, %5 : vector<32x32xf32>
    %36 = arith.addf %33, %35 : vector<32x32xf32>
    %cst_22 = arith.constant 5.000000e-01 : f32
    %37 = vector.broadcast %cst_22 : f32 to vector<32x32xf32>
    %38 = arith.addf %36, %37 : vector<32x32xf32>
    %c0_23 = arith.constant 0 : index
    %c0_24 = arith.constant 0 : index
    %39 = vector.load %arg3[%c0_23, %c0_24] : memref<16x32xf32, #tpu.memory_space<vmem>>, vector<16x32xf32>
    %c0_25 = arith.constant 0 : index
    %c0_26 = arith.constant 0 : index
    %40 = vector.load %arg4[%c0_25, %c0_26] : memref<32x16xf32, #tpu.memory_space<vmem>>, vector<32x16xf32>
    %cst_27 = arith.constant dense<0.000000e+00> : vector<16x32xf32>
    %41 = tpu.matmul %39, %28, %cst_27 {dimension_numbers = #tpu.dot_dimension_numbers<[1], [0], [0], [1], [0, 0, 1, 1], [], []>} : vector<16x32xf32>, vector<32x32xf32>, vector<16x32xf32> -> vector<16x32xf32>
    %cst_28 = arith.constant dense<0.000000e+00> : vector<16x16xf32>
    %42 = tpu.matmul %41, %40, %cst_28 {dimension_numbers = #tpu.dot_dimension_numbers<[1], [0], [0], [1], [0, 0, 1, 1], [], []>} : vector<16x32xf32>, vector<32x16xf32>, vector<16x16xf32> -> vector<16x16xf32>
    %c0_29 = arith.constant 0 : index
    %c0_30 = arith.constant 0 : index
    %c0_31 = arith.constant 0 : index
    %c0_32 = arith.constant 0 : index
    %43 = vector.load %arg6[%c0_29, %c0_30, %c0_31, %c0_32] : memref<1x2x16x16xf32, #tpu.memory_space<vmem>>, vector<1x1x16x16xf32>
    %44 = vector.shape_cast %43 : vector<1x1x16x16xf32> to vector<16x16xf32>
    %45 = vector.shape_cast %42 : vector<16x16xf32> to vector<1x1x16x16xf32>
    tpu.vector_store %arg6[%c0_29, %c0_30, %c0_31, %c0_32], %45 {strides = array<i32>} : memref<1x2x16x16xf32, #tpu.memory_space<vmem>>, vector<1x1x16x16xf32>,
    %cst_33 = arith.constant dense<0.000000e+00> : vector<16x32xf32>
    %46 = tpu.matmul %39, %38, %cst_33 {dimension_numbers = #tpu.dot_dimension_numbers<[1], [0], [0], [1], [0, 0, 1, 1], [], []>} : vector<16x32xf32>, vector<32x32xf32>, vector<16x32xf32> -> vector<16x32xf32>
    %cst_34 = arith.constant dense<0.000000e+00> : vector<16x16xf32>
    %47 = tpu.matmul %46, %40, %cst_34 {dimension_numbers = #tpu.dot_dimension_numbers<[1], [0], [0], [1], [0, 0, 1, 1], [], []>} : vector<16x32xf32>, vector<32x16xf32>, vector<16x16xf32> -> vector<16x16xf32>
    %c0_35 = arith.constant 0 : index
    %c1_36 = arith.constant 1 : index
    %c0_37 = arith.constant 0 : index
    %c0_38 = arith.constant 0 : index
    %48 = vector.load %arg6[%c0_35, %c1_36, %c0_37, %c0_38] : memref<1x2x16x16xf32, #tpu.memory_space<vmem>>, vector<1x1x16x16xf32>
    %49 = vector.shape_cast %48 : vector<1x1x16x16xf32> to vector<16x16xf32>
    %50 = vector.shape_cast %47 : vector<16x16xf32> to vector<1x1x16x16xf32>
    tpu.vector_store %arg6[%c0_35, %c1_36, %c0_37, %c0_38], %50 {strides = array<i32>} : memref<1x2x16x16xf32, #tpu.memory_space<vmem>>, vector<1x1x16x16xf32>,
    return
  }
  func.func @transform_0(%arg0: i32, %arg1: i32) -> (i32, i32, i32, i32) {
    %c0_i32 = arith.constant 0 : i32
    %c0_i32_0 = arith.constant 0 : i32
    %c0_i32_1 = arith.constant 0 : i32
    return %arg0, %c0_i32, %arg1, %c0_i32_0 : i32, i32, i32, i32
  }
  func.func @transform_1(%arg0: i32, %arg1: i32) -> (i32, i32) {
    %c0_i32 = arith.constant 0 : i32
    %c0_i32_0 = arith.constant 0 : i32
    %c0_i32_1 = arith.constant 0 : i32
    return %c0_i32, %c0_i32_0 : i32, i32
  }
  func.func @transform_2(%arg0: i32, %arg1: i32) -> (i32, i32) {
    %c0_i32 = arith.constant 0 : i32
    %c0_i32_0 = arith.constant 0 : i32
    %c0_i32_1 = arith.constant 0 : i32
    return %c0_i32, %c0_i32_0 : i32, i32
  }
  func.func @transform_3(%arg0: i32, %arg1: i32) -> (i32, i32, i32) {
    %c0_i32 = arith.constant 0 : i32
    %c0_i32_0 = arith.constant 0 : i32
    return %arg0, %arg1, %c0_i32 : i32, i32, i32
  }
  func.func @transform_4(%arg0: i32, %arg1: i32) -> (i32, i32, i32, i32) {
    %c0_i32 = arith.constant 0 : i32
    %c0_i32_0 = arith.constant 0 : i32
    %c0_i32_1 = arith.constant 0 : i32
    return %arg0, %c0_i32, %arg1, %c0_i32_0 : i32, i32, i32, i32
  }
}

module attributes {stable_mosaic.version = 11 : i64} {
  func.func @_dct_lpf_idct_kernel(%arg0: i32, %arg1: i32, %arg2: memref<64x16xf32, #tpu.memory_space<vmem>>, %arg3: memref<64x64xf32, #tpu.memory_space<vmem>>, %arg4: memref<16x16xf32, #tpu.memory_space<vmem>>, %arg5: memref<64x16xf32, #tpu.memory_space<vmem>>) attributes {dimension_semantics = [#tpu.dimension_semantics<parallel>, #tpu.dimension_semantics<parallel>], iteration_bounds = array<i64: 1, 1>, scalar_prefetch = 0 : i64, scratch_operands = 0 : i64, tpu.core_type = #tpu.core_type<tc>, window_params = [{transform_indices = @transform_0, window_bounds = array<i64: 64, 16>}, {pipeline_mode = #tpu.pipeline_mode<synchronous>, transform_indices = @transform_1, window_bounds = array<i64: 64, 64>}, {pipeline_mode = #tpu.pipeline_mode<synchronous>, transform_indices = @transform_2, window_bounds = array<i64: 16, 16>}, {transform_indices = @transform_3, window_bounds = array<i64: 64, 16>}]} {
    %c0 = arith.constant 0 : index
    %c0_0 = arith.constant 0 : index
    %0 = vector.load %arg3[%c0, %c0_0] : memref<64x64xf32, #tpu.memory_space<vmem>>, vector<64x64xf32>
    %c0_1 = arith.constant 0 : index
    %c0_2 = arith.constant 0 : index
    %1 = vector.load %arg2[%c0_1, %c0_2] : memref<64x16xf32, #tpu.memory_space<vmem>>, vector<64x16xf32>
    %cst = arith.constant dense<0.000000e+00> : vector<64x16xf32>
    %2 = tpu.matmul %0, %1, %cst {dimension_numbers = #tpu.dot_dimension_numbers<[1], [0], [0], [1], [0, 0, 1, 1], [], []>} : vector<64x64xf32>, vector<64x16xf32>, vector<64x16xf32> -> vector<64x16xf32>
    %c0_3 = arith.constant 0 : index
    %c0_4 = arith.constant 0 : index
    %3 = vector.load %arg4[%c0_3, %c0_4] : memref<16x16xf32, #tpu.memory_space<vmem>>, vector<16x16xf32>
    %cst_5 = arith.constant dense<0.000000e+00> : vector<64x16xf32>
    %4 = tpu.matmul %2, %3, %cst_5 {dimension_numbers = #tpu.dot_dimension_numbers<[1], [0], [0], [1], [0, 0, 1, 1], [], []>} : vector<64x16xf32>, vector<16x16xf32>, vector<64x16xf32> -> vector<64x16xf32>
    %c0_6 = arith.constant 0 : index
    %c0_7 = arith.constant 0 : index
    %5 = vector.load %arg5[%c0_6, %c0_7] : memref<64x16xf32, #tpu.memory_space<vmem>>, vector<64x16xf32>
    tpu.vector_store %arg5[%c0_6, %c0_7], %4 {strides = array<i32>} : memref<64x16xf32, #tpu.memory_space<vmem>>, vector<64x16xf32>,
    return
  }
  func.func @transform_0(%arg0: i32, %arg1: i32) -> (i32, i32) {
    %c0_i32 = arith.constant 0 : i32
    return %arg0, %arg1 : i32, i32
  }
  func.func @transform_1(%arg0: i32, %arg1: i32) -> (i32, i32) {
    %c0_i32 = arith.constant 0 : i32
    %c0_i32_0 = arith.constant 0 : i32
    %c0_i32_1 = arith.constant 0 : i32
    return %c0_i32, %c0_i32_0 : i32, i32
  }
  func.func @transform_2(%arg0: i32, %arg1: i32) -> (i32, i32) {
    %c0_i32 = arith.constant 0 : i32
    %c0_i32_0 = arith.constant 0 : i32
    %c0_i32_1 = arith.constant 0 : i32
    return %c0_i32, %c0_i32_0 : i32, i32
  }
  func.func @transform_3(%arg0: i32, %arg1: i32) -> (i32, i32) {
    %c0_i32 = arith.constant 0 : i32
    return %arg0, %arg1 : i32, i32
  }
}

module attributes {stable_mosaic.version = 11 : i64} {
  func.func @_ycbcr_up_to_rgb_kernel(%arg0: i32, %arg1: i32, %arg2: memref<1x32x32xf32, #tpu.memory_space<vmem>>, %arg3: memref<1x2x16x16xf32, #tpu.memory_space<vmem>>, %arg4: memref<32x16xf32, #tpu.memory_space<vmem>>, %arg5: memref<16x32xf32, #tpu.memory_space<vmem>>, %arg6: memref<1x3x32x32xf32, #tpu.memory_space<vmem>>) attributes {dimension_semantics = [#tpu.dimension_semantics<parallel>, #tpu.dimension_semantics<parallel>], iteration_bounds = array<i64: 2, 1>, scalar_prefetch = 0 : i64, scratch_operands = 0 : i64, tpu.core_type = #tpu.core_type<tc>, window_params = [{transform_indices = @transform_0, window_bounds = array<i64: 1, 32, 32>}, {transform_indices = @transform_1, window_bounds = array<i64: 1, 2, 16, 16>}, {transform_indices = @transform_2, window_bounds = array<i64: 32, 16>}, {pipeline_mode = #tpu.pipeline_mode<synchronous>, transform_indices = @transform_3, window_bounds = array<i64: 16, 32>}, {transform_indices = @transform_4, window_bounds = array<i64: 1, 3, 32, 32>}]} {
    %c0 = arith.constant 0 : index
    %c0_0 = arith.constant 0 : index
    %0 = vector.load %arg4[%c0, %c0_0] : memref<32x16xf32, #tpu.memory_space<vmem>>, vector<32x16xf32>
    %c0_1 = arith.constant 0 : index
    %c0_2 = arith.constant 0 : index
    %1 = vector.load %arg5[%c0_1, %c0_2] : memref<16x32xf32, #tpu.memory_space<vmem>>, vector<16x32xf32>
    %c0_3 = arith.constant 0 : index
    %c0_4 = arith.constant 0 : index
    %c0_5 = arith.constant 0 : index
    %c0_6 = arith.constant 0 : index
    %2 = vector.load %arg3[%c0_3, %c0_4, %c0_5, %c0_6] : memref<1x2x16x16xf32, #tpu.memory_space<vmem>>, vector<1x1x16x16xf32>
    %3 = vector.shape_cast %2 : vector<1x1x16x16xf32> to vector<16x16xf32>
    %cst = arith.constant dense<0.000000e+00> : vector<32x16xf32>
    %4 = tpu.matmul %0, %3, %cst {dimension_numbers = #tpu.dot_dimension_numbers<[1], [0], [0], [1], [0, 0, 1, 1], [], []>} : vector<32x16xf32>, vector<16x16xf32>, vector<32x16xf32> -> vector<32x16xf32>
    %cst_7 = arith.constant dense<0.000000e+00> : vector<32x32xf32>
    %5 = tpu.matmul %4, %1, %cst_7 {dimension_numbers = #tpu.dot_dimension_numbers<[1], [0], [0], [1], [0, 0, 1, 1], [], []>} : vector<32x16xf32>, vector<16x32xf32>, vector<32x32xf32> -> vector<32x32xf32>
    %c0_8 = arith.constant 0 : index
    %c1 = arith.constant 1 : index
    %c0_9 = arith.constant 0 : index
    %c0_10 = arith.constant 0 : index
    %6 = vector.load %arg3[%c0_8, %c1, %c0_9, %c0_10] : memref<1x2x16x16xf32, #tpu.memory_space<vmem>>, vector<1x1x16x16xf32>
    %7 = vector.shape_cast %6 : vector<1x1x16x16xf32> to vector<16x16xf32>
    %cst_11 = arith.constant dense<0.000000e+00> : vector<32x16xf32>
    %8 = tpu.matmul %0, %7, %cst_11 {dimension_numbers = #tpu.dot_dimension_numbers<[1], [0], [0], [1], [0, 0, 1, 1], [], []>} : vector<32x16xf32>, vector<16x16xf32>, vector<32x16xf32> -> vector<32x16xf32>
    %cst_12 = arith.constant dense<0.000000e+00> : vector<32x32xf32>
    %9 = tpu.matmul %8, %1, %cst_12 {dimension_numbers = #tpu.dot_dimension_numbers<[1], [0], [0], [1], [0, 0, 1, 1], [], []>} : vector<32x16xf32>, vector<16x32xf32>, vector<32x32xf32> -> vector<32x32xf32>
    %c0_13 = arith.constant 0 : index
    %c0_14 = arith.constant 0 : index
    %c0_15 = arith.constant 0 : index
    %10 = vector.load %arg2[%c0_13, %c0_14, %c0_15] : memref<1x32x32xf32, #tpu.memory_space<vmem>>, vector<1x32x32xf32>
    %11 = vector.shape_cast %10 : vector<1x32x32xf32> to vector<32x32xf32>
    %cst_16 = arith.constant 2.000000e+00 : f32
    %12 = vector.broadcast %cst_16 : f32 to vector<32x32xf32>
    %13 = arith.mulf %12, %11 : vector<32x32xf32>
    %cst_17 = arith.constant 2.804000e+00 : f32
    %14 = vector.broadcast %cst_17 : f32 to vector<32x32xf32>
    %15 = arith.mulf %14, %9 : vector<32x32xf32>
    %16 = arith.addf %13, %15 : vector<32x32xf32>
    %cst_18 = arith.constant -2.402000e+00 : f32
    %17 = vector.broadcast %cst_18 : f32 to vector<32x32xf32>
    %18 = arith.addf %16, %17 : vector<32x32xf32>
    %c0_19 = arith.constant 0 : index
    %c0_20 = arith.constant 0 : index
    %c0_21 = arith.constant 0 : index
    %c0_22 = arith.constant 0 : index
    %19 = vector.load %arg6[%c0_19, %c0_20, %c0_21, %c0_22] : memref<1x3x32x32xf32, #tpu.memory_space<vmem>>, vector<1x1x32x32xf32>
    %20 = vector.shape_cast %19 : vector<1x1x32x32xf32> to vector<32x32xf32>
    %21 = vector.shape_cast %18 : vector<32x32xf32> to vector<1x1x32x32xf32>
    tpu.vector_store %arg6[%c0_19, %c0_20, %c0_21, %c0_22], %21 {strides = array<i32>} : memref<1x3x32x32xf32, #tpu.memory_space<vmem>>, vector<1x1x32x32xf32>,
    %cst_23 = arith.constant 0.688272595 : f32
    %22 = vector.broadcast %cst_23 : f32 to vector<32x32xf32>
    %23 = arith.mulf %22, %5 : vector<32x32xf32>
    %24 = arith.subf %13, %23 : vector<32x32xf32>
    %cst_24 = arith.constant 1.4282726 : f32
    %25 = vector.broadcast %cst_24 : f32 to vector<32x32xf32>
    %26 = arith.mulf %25, %9 : vector<32x32xf32>
    %27 = arith.subf %24, %26 : vector<32x32xf32>
    %cst_25 = arith.constant 0.0582725704 : f32
    %28 = vector.broadcast %cst_25 : f32 to vector<32x32xf32>
    %29 = arith.addf %27, %28 : vector<32x32xf32>
    %c0_26 = arith.constant 0 : index
    %c1_27 = arith.constant 1 : index
    %c0_28 = arith.constant 0 : index
    %c0_29 = arith.constant 0 : index
    %30 = vector.load %arg6[%c0_26, %c1_27, %c0_28, %c0_29] : memref<1x3x32x32xf32, #tpu.memory_space<vmem>>, vector<1x1x32x32xf32>
    %31 = vector.shape_cast %30 : vector<1x1x32x32xf32> to vector<32x32xf32>
    %32 = vector.shape_cast %29 : vector<32x32xf32> to vector<1x1x32x32xf32>
    tpu.vector_store %arg6[%c0_26, %c1_27, %c0_28, %c0_29], %32 {strides = array<i32>} : memref<1x3x32x32xf32, #tpu.memory_space<vmem>>, vector<1x1x32x32xf32>,
    %cst_30 = arith.constant 3.544000e+00 : f32
    %33 = vector.broadcast %cst_30 : f32 to vector<32x32xf32>
    %34 = arith.mulf %33, %5 : vector<32x32xf32>
    %35 = arith.addf %13, %34 : vector<32x32xf32>
    %cst_31 = arith.constant -2.772000e+00 : f32
    %36 = vector.broadcast %cst_31 : f32 to vector<32x32xf32>
    %37 = arith.addf %35, %36 : vector<32x32xf32>
    %c0_32 = arith.constant 0 : index
    %c2 = arith.constant 2 : index
    %c0_33 = arith.constant 0 : index
    %c0_34 = arith.constant 0 : index
    %38 = vector.load %arg6[%c0_32, %c2, %c0_33, %c0_34] : memref<1x3x32x32xf32, #tpu.memory_space<vmem>>, vector<1x1x32x32xf32>
    %39 = vector.shape_cast %38 : vector<1x1x32x32xf32> to vector<32x32xf32>
    %40 = vector.shape_cast %37 : vector<32x32xf32> to vector<1x1x32x32xf32>
    tpu.vector_store %arg6[%c0_32, %c2, %c0_33, %c0_34], %40 {strides = array<i32>} : memref<1x3x32x32xf32, #tpu.memory_space<vmem>>, vector<1x1x32x32xf32>,
    return
  }
  func.func @transform_0(%arg0: i32, %arg1: i32) -> (i32, i32, i32) {
    %c0_i32 = arith.constant 0 : i32
    %c0_i32_0 = arith.constant 0 : i32
    return %arg0, %arg1, %c0_i32 : i32, i32, i32
  }
  func.func @transform_1(%arg0: i32, %arg1: i32) -> (i32, i32, i32, i32) {
    %c0_i32 = arith.constant 0 : i32
    %c0_i32_0 = arith.constant 0 : i32
    %c0_i32_1 = arith.constant 0 : i32
    %c0_i32_2 = arith.constant 0 : i32
    return %arg0, %c0_i32, %c0_i32_0, %c0_i32_1 : i32, i32, i32, i32
  }
  func.func @transform_2(%arg0: i32, %arg1: i32) -> (i32, i32) {
    %c0_i32 = arith.constant 0 : i32
    %c0_i32_0 = arith.constant 0 : i32
    return %arg1, %c0_i32 : i32, i32
  }
  func.func @transform_3(%arg0: i32, %arg1: i32) -> (i32, i32) {
    %c0_i32 = arith.constant 0 : i32
    %c0_i32_0 = arith.constant 0 : i32
    %c0_i32_1 = arith.constant 0 : i32
    return %c0_i32, %c0_i32_0 : i32, i32
  }
  func.func @transform_4(%arg0: i32, %arg1: i32) -> (i32, i32, i32, i32) {
    %c0_i32 = arith.constant 0 : i32
    %c0_i32_0 = arith.constant 0 : i32
    %c0_i32_1 = arith.constant 0 : i32
    return %arg0, %c0_i32, %arg1, %c0_i32_0 : i32, i32, i32, i32
  }
}

</mosaic_0001>

<bundles_post_ra>
// kernel: dct_forward.6
= control target key start
LH: loop header
LB: loop body
LE: loop exit
PB: predicated region body
PF: predicated region fallthrough
CT: control target
= control target key end

     0   :  { %vm30_vm0 = vcmask 523264   ;;  %vm162_vm1 = vcmask 130048   ;;  %s532_s0 = inlined_call_operand.vmem [shape: f32[64,16], index: 0, kind: input, shape index: {}]   ;;  %s533_s1 = inlined_call_operand.vmem [shape: f32[64,64], index: 1, kind: input, shape index: {}]   ;;  %s534_s2 = inlined_call_operand.vmem [shape: f32[16,16], index: 2, kind: input, shape index: {}]   ;;  %s535_s3 = inlined_call_operand.vmem [shape: f32[64,16], index: 3, kind: output, shape index: {}]  }
   0x1   :  { %v22_v0 = vld [vmem:[%s532_s0] sm:$0xff]  ;;  %v23_v1 = vld [vmem:[%s532_s0 + $0x8] sm:$0xff]  ;;  %v24_v2 = vld [vmem:[%s532_s0 + $0x10] sm:$0xff] }
   0x2   :  { %v390_v3 = vpack.c.bf16 %v23_v1, %v22_v0  ;;  %v25_v4 = vld [vmem:[%s532_s0 + $0x18] sm:$0xff]  ;;  %v26_v6 = vld [vmem:[%s532_s0 + $0x20] sm:$0xff]  ;;  %v27_v7 = vld [vmem:[%s532_s0 + $0x28] sm:$0xff] }
   0x3   :  { %v394_v5 = vpack.c.bf16 %v25_v4, %v24_v2  ;;  %v14_v8 = vld [vmem:[%s533_s1] sm:$0xff]  ;;  %v398_v9 = vpack.c.bf16 %v27_v7, %v26_v6  ;;  %v161_v11 = vld [vmem:[%s534_s2 + $0x8] sm:$0xff]  ;;  %v28_v12 = vld [vmem:[%s532_s0 + $0x30] sm:$0xff] }
   0x4   :  { %391 = vmatprep.subr.bf16.mxu0 %v390_v3  ;;  %362 = vmatprep.mubr.msk.f32.mxu0 %vm30_vm0, %v14_v8  ;;  %v160_v10 = vld [vmem:[%s534_s2] sm:$0xff]  ;;  %v29_v13 = vld [vmem:[%s532_s0 + $0x38] sm:$0xff]  ;;  %v15_v16 = vld [vmem:[%s533_s1 + $0x8] sm:$0xff] }
   0x5   :  { %393 = vmatpush3.bf16.msra.mxu0 %v390_v3  ;;  %v406_v14 = vpack.c.bf16 %v161_v11, %v160_v10  ;;  %v402_v15 = vpack.c.bf16 %v29_v13, %v28_v12  ;;  %v16_v17 = vld [vmem:[%s533_s1 + $0x10] sm:$0xff]  ;;  %v17_v18 = vld [vmem:[%s533_s1 + $0x18] sm:$0xff]  ;;  %v18_v19 = vld [vmem:[%s533_s1 + $0x20] sm:$0xff] }
   0x6   :  { %395 = vmatprep.subr.bf16.mxu0 %v394_v5  ;;  %v19_v20 = vld [vmem:[%s533_s1 + $0x28] sm:$0xff]  ;;  %v20_v21 = vld [vmem:[%s533_s1 + $0x30] sm:$0xff]  ;;  %v21_v22 = vld [vmem:[%s533_s1 + $0x38] sm:$0xff] }
   0x7   :  { %407 = vmatprep.subr.bf16.mxu1 %v406_v14 }
   0x8   :  { %409 = vmatpush3.bf16.msra.mxu1 %v406_v14 }
   0x9   :  { %397 = vmatpush3.bf16.msra.mxu0 %v394_v5 }
   0xa   :  { %399 = vmatprep.subr.bf16.mxu0 %v398_v9 }
   0xd   :  { %401 = vmatpush3.bf16.msra.mxu0 %v398_v9 }
   0xe   :  { %403 = vmatprep.subr.bf16.mxu0 %v402_v15 }
  0x11   :  { %405 = vmatpush3.bf16.msra.mxu0 %v402_v15 }
  0x14   :  { %363 = vmatmul.mubr.msk.f32.vlgmr.msra.gmra.mrb[0].mxu0 %vm30_vm0, %v15_v16 }
  0x15   :  { %365 = vmatprep.mubr.msk.f32.mxu0 %vm30_vm0, %v16_v17 }
  0x18   :  { %366 = vmatmul.mubr.msk.f32.gmra.mrb[2].mxu0 %vm30_vm0, %v17_v18 }
  0x19   :  { %368 = vmatprep.mubr.msk.f32.mxu0 %vm30_vm0, %v18_v19 }
  0x1c   :  { %369 = vmatmul.mubr.msk.f32.gmra.mrb[4].mxu0 %vm30_vm0, %v19_v20 }
  0x1d   :  { %371 = vmatprep.mubr.msk.f32.mxu0 %vm30_vm0, %v20_v21 }
  0x20   :  { %372 = vmatmul.mubr.msk.f32.gmra.mrb[6].mxu0 %vm30_vm0, %v21_v22 }
  0xe7   :  { %v364_v23 = vpop.f32.mrb[0].mxu0 }
  0xe8   :  { %v121_v24 = vpop.f32.mrb[1].mxu0 }
  0xe9   :  { %378 = vmatprep.mubr.msk.f32.mxu1 %vm162_vm1, %v121_v24 }
  0xea   :  { %379 = vmatmul.mubr.msk.f32.vlgmr.msra.gmra.mrb[0].mxu1 %vm162_vm1, %v364_v23 }
  0xeb   :  { %v367_v25 = vpop.f32.mrb[2].mxu0 }
  0xec   :  { %v131_v26 = vpop.f32.mrb[3].mxu0 }
  0xed   :  { %381 = vmatprep.mubr.msk.f32.mxu1 %vm162_vm1, %v131_v26 }
  0xee   :  { %382 = vmatmul.mubr.msk.f32.gmra.mrb[2].mxu1 %vm162_vm1, %v367_v25 }
  0xef   :  { %v370_v27 = vpop.f32.mrb[4].mxu0 }
  0xf0   :  { %v141_v28 = vpop.f32.mrb[5].mxu0 }
  0xf1   :  { %384 = vmatprep.mubr.msk.f32.mxu1 %vm162_vm1, %v141_v28 }
  0xf2   :  { %385 = vmatmul.mubr.msk.f32.gmra.mrb[4].mxu1 %vm162_vm1, %v370_v27 }
  0xf3   :  { %v373_v29 = vpop.f32.mrb[6].mxu0 }
  0xf4   :  { %v151_v30 = vpop.f32.mrb[7].mxu0 }
  0xf5   :  { %387 = vmatprep.mubr.msk.f32.mxu1 %vm162_vm1, %v151_v30 }
  0xf6   :  { %388 = vmatmul.mubr.msk.f32.gmra.mrb[6].mxu1 %vm162_vm1, %v373_v29 }
 0x1bd   :  { %v380_v31 = vpop.f32.mrb[0].mxu1 }
 0x1be   :  { %293 = vst.msk [vmem:[%s535_s3 + $0x8] sm:$0xff] %vm162_vm1, %v380_v31  ;;  %v253_v32 = vpop.f32.mrb[1].mxu1 }
 0x1bf   :  { %292 = vst.msk [vmem:[%s535_s3] sm:$0xff] %vm162_vm1, %v253_v32 }
 0x1c1   :  { %v383_v33 = vpop.f32.mrb[2].mxu1 }
 0x1c2   :  { %295 = vst.msk [vmem:[%s535_s3 + $0x18] sm:$0xff] %vm162_vm1, %v383_v33  ;;  %v263_v34 = vpop.f32.mrb[3].mxu1 }
 0x1c3   :  { %294 = vst.msk [vmem:[%s535_s3 + $0x10] sm:$0xff] %vm162_vm1, %v263_v34 }
 0x1c5   :  { %v386_v35 = vpop.f32.mrb[4].mxu1 }
 0x1c6   :  { %297 = vst.msk [vmem:[%s535_s3 + $0x28] sm:$0xff] %vm162_vm1, %v386_v35  ;;  %v273_v36 = vpop.f32.mrb[5].mxu1 }
 0x1c7   :  { %296 = vst.msk [vmem:[%s535_s3 + $0x20] sm:$0xff] %vm162_vm1, %v273_v36 }
 0x1c9   :  { %v389_v37 = vpop.f32.mrb[6].mxu1 }
 0x1ca   :  { %299 = vst.msk [vmem:[%s535_s3 + $0x38] sm:$0xff] %vm162_vm1, %v389_v37  ;;  %v283_v38 = vpop.f32.mrb[7].mxu1 }
 0x1cb   :  { %298 = vst.msk [vmem:[%s535_s3 + $0x30] sm:$0xff] %vm162_vm1, %v283_v38 }

// kernel: dct_forward.5
= control target key start
LH: loop header
LB: loop body
LE: loop exit
PB: predicated region body
PF: predicated region fallthrough
CT: control target
= control target key end

     0   :  { %vm30_vm0 = vcmask 523264   ;;  %vm164_vm1 = vcmask 261120   ;;  %s550_s0 = inlined_call_operand.vmem [shape: f32[64,32], index: 0, kind: input, shape index: {}]   ;;  %s551_s1 = inlined_call_operand.vmem [shape: f32[64,64], index: 1, kind: input, shape index: {}]   ;;  %s552_s2 = inlined_call_operand.vmem [shape: f32[32,32], index: 2, kind: input, shape index: {}]   ;;  %s553_s3 = inlined_call_operand.vmem [shape: f32[64,32], index: 3, kind: output, shape index: {}]  }
   0x1   :  { %v22_v0 = vld [vmem:[%s550_s0] sm:$0xff]  ;;  %v23_v1 = vld [vmem:[%s550_s0 + $0x8] sm:$0xff]  ;;  %v24_v2 = vld [vmem:[%s550_s0 + $0x10] sm:$0xff] }
   0x2   :  { %v398_v3 = vpack.c.bf16 %v23_v1, %v22_v0  ;;  %v25_v4 = vld [vmem:[%s550_s0 + $0x18] sm:$0xff]  ;;  %v26_v6 = vld [vmem:[%s550_s0 + $0x20] sm:$0xff]  ;;  %v27_v7 = vld [vmem:[%s550_s0 + $0x28] sm:$0xff] }
   0x3   :  { %v402_v5 = vpack.c.bf16 %v25_v4, %v24_v2  ;;  %v14_v8 = vld [vmem:[%s551_s1] sm:$0xff]  ;;  %v406_v9 = vpack.c.bf16 %v27_v7, %v26_v6  ;;  %v28_v10 = vld [vmem:[%s550_s0 + $0x30] sm:$0xff]  ;;  %v161_v12 = vld [vmem:[%s552_s2 + $0x8] sm:$0xff] }
   0x4   :  { %399 = vmatprep.subr.bf16.mxu0 %v398_v3  ;;  %366 = vmatprep.mubr.msk.f32.mxu0 %vm30_vm0, %v14_v8  ;;  %v160_v11 = vld [vmem:[%s552_s2] sm:$0xff]  ;;  %v29_v13 = vld [vmem:[%s550_s0 + $0x38] sm:$0xff]  ;;  %v162_v15 = vld [vmem:[%s552_s2 + $0x10] sm:$0xff] }
   0x5   :  { %401 = vmatpush3.bf16.msra.mxu0 %v398_v3  ;;  %v414_v14 = vpack.c.bf16 %v161_v12, %v160_v11  ;;  %v163_v16 = vld [vmem:[%s552_s2 + $0x18] sm:$0xff]  ;;  %v410_v18 = vpack.c.bf16 %v29_v13, %v28_v10  ;;  %v15_v19 = vld [vmem:[%s551_s1 + $0x8] sm:$0xff]  ;;  %v16_v20 = vld [vmem:[%s551_s1 + $0x10] sm:$0xff] }
   0x6   :  { %403 = vmatprep.subr.bf16.mxu0 %v402_v5  ;;  %v418_v17 = vpack.c.bf16 %v163_v16, %v162_v15  ;;  %v17_v21 = vld [vmem:[%s551_s1 + $0x18] sm:$0xff]  ;;  %v18_v22 = vld [vmem:[%s551_s1 + $0x20] sm:$0xff]  ;;  %v19_v23 = vld [vmem:[%s551_s1 + $0x28] sm:$0xff] }
   0x7   :  { %415 = vmatprep.subr.bf16.mxu1 %v414_v14  ;;  %v20_v24 = vld [vmem:[%s551_s1 + $0x30] sm:$0xff]  ;;  %v21_v25 = vld [vmem:[%s551_s1 + $0x38] sm:$0xff] }
   0x8   :  { %417 = vmatpush3.bf16.msra.mxu1 %v414_v14 }
   0x9   :  { %405 = vmatpush3.bf16.msra.mxu0 %v402_v5  ;;  %419 = vmatprep.subr.bf16.mxu1 %v418_v17 }
   0xa   :  { %407 = vmatprep.subr.bf16.mxu0 %v406_v9 }
   0xc   :  { %421 = vmatpush3.bf16.msra.mxu1 %v418_v17 }
   0xd   :  { %409 = vmatpush3.bf16.msra.mxu0 %v406_v9 }
   0xe   :  { %411 = vmatprep.subr.bf16.mxu0 %v410_v18 }
  0x11   :  { %413 = vmatpush3.bf16.msra.mxu0 %v410_v18 }
  0x14   :  { %367 = vmatmul.mubr.msk.f32.vlgmr.msra.gmra.mrb[0].mxu0 %vm30_vm0, %v15_v19 }
  0x15   :  { %369 = vmatprep.mubr.msk.f32.mxu0 %vm30_vm0, %v16_v20 }
  0x18   :  { %370 = vmatmul.mubr.msk.f32.gmra.mrb[2].mxu0 %vm30_vm0, %v17_v21 }
  0x19   :  { %372 = vmatprep.mubr.msk.f32.mxu0 %vm30_vm0, %v18_v22 }
  0x1c   :  { %373 = vmatmul.mubr.msk.f32.gmra.mrb[4].mxu0 %vm30_vm0, %v19_v23 }
  0x1d   :  { %375 = vmatprep.mubr.msk.f32.mxu0 %vm30_vm0, %v20_v24 }
  0x20   :  { %376 = vmatmul.mubr.msk.f32.gmra.mrb[6].mxu0 %vm30_vm0, %v21_v25 }
  0xe7   :  { %v368_v26 = vpop.f32.mrb[0].mxu0 }
  0xe8   :  { %v121_v27 = vpop.f32.mrb[1].mxu0 }
  0xe9   :  { %386 = vmatprep.mubr.msk.f32.mxu1 %vm164_vm1, %v121_v27 }
  0xea   :  { %387 = vmatmul.mubr.msk.f32.vlgmr.msra.gmra.mrb[0].mxu1 %vm164_vm1, %v368_v26 }
  0xeb   :  { %v371_v28 = vpop.f32.mrb[2].mxu0 }
  0xec   :  { %v131_v29 = vpop.f32.mrb[3].mxu0 }
  0xed   :  { %389 = vmatprep.mubr.msk.f32.mxu1 %vm164_vm1, %v131_v29 }
  0xee   :  { %390 = vmatmul.mubr.msk.f32.gmra.mrb[2].mxu1 %vm164_vm1, %v371_v28 }
  0xef   :  { %v374_v30 = vpop.f32.mrb[4].mxu0 }
  0xf0   :  { %v141_v31 = vpop.f32.mrb[5].mxu0 }
  0xf1   :  { %392 = vmatprep.mubr.msk.f32.mxu1 %vm164_vm1, %v141_v31 }
  0xf2   :  { %393 = vmatmul.mubr.msk.f32.gmra.mrb[4].mxu1 %vm164_vm1, %v374_v30 }
  0xf3   :  { %v377_v32 = vpop.f32.mrb[6].mxu0 }
  0xf4   :  { %v151_v33 = vpop.f32.mrb[7].mxu0 }
  0xf5   :  { %395 = vmatprep.mubr.msk.f32.mxu1 %vm164_vm1, %v151_v33 }
  0xf6   :  { %396 = vmatmul.mubr.msk.f32.gmra.mrb[6].mxu1 %vm164_vm1, %v377_v32 }
 0x1bd   :  { %v388_v34 = vpop.f32.mrb[0].mxu1 }
 0x1be   :  { %295 = vst.msk [vmem:[%s553_s3 + $0x8] sm:$0xff] %vm164_vm1, %v388_v34  ;;  %v255_v35 = vpop.f32.mrb[1].mxu1 }
 0x1bf   :  { %294 = vst.msk [vmem:[%s553_s3] sm:$0xff] %vm164_vm1, %v255_v35 }
 0x1c1   :  { %v391_v36 = vpop.f32.mrb[2].mxu1 }
 0x1c2   :  { %297 = vst.msk [vmem:[%s553_s3 + $0x18] sm:$0xff] %vm164_vm1, %v391_v36  ;;  %v265_v37 = vpop.f32.mrb[3].mxu1 }
 0x1c3   :  { %296 = vst.msk [vmem:[%s553_s3 + $0x10] sm:$0xff] %vm164_vm1, %v265_v37 }
 0x1c5   :  { %v394_v38 = vpop.f32.mrb[4].mxu1 }
 0x1c6   :  { %299 = vst.msk [vmem:[%s553_s3 + $0x28] sm:$0xff] %vm164_vm1, %v394_v38  ;;  %v275_v39 = vpop.f32.mrb[5].mxu1 }
 0x1c7   :  { %298 = vst.msk [vmem:[%s553_s3 + $0x20] sm:$0xff] %vm164_vm1, %v275_v39 }
 0x1c9   :  { %v397_v40 = vpop.f32.mrb[6].mxu1 }
 0x1ca   :  { %301 = vst.msk [vmem:[%s553_s3 + $0x38] sm:$0xff] %vm164_vm1, %v397_v40  ;;  %v285_v41 = vpop.f32.mrb[7].mxu1 }
 0x1cb   :  { %300 = vst.msk [vmem:[%s553_s3 + $0x30] sm:$0xff] %vm164_vm1, %v285_v41 }

// kernel: dct_forward.4
= control target key start
LH: loop header
LB: loop body
LE: loop exit
PB: predicated region body
PF: predicated region fallthrough
CT: control target
= control target key end

     0   :  { %10 = vsyncpa [#allocation3], 0  ;;  %s1424_s0 = inlined_call_operand.hbm [shape: f32[2,3,32,32], index: 0, kind: input, shape index: {}]   ;;  %s1425_s1 = inlined_call_operand.vmem [shape: f32[16,32], index: 1, kind: input, shape index: {}]   ;;  %s1426_s2 = inlined_call_operand.hbm [shape: f32[32,16], index: 2, kind: input, shape index: {}]   ;;  %s1427_s3 = inlined_call_operand.vmem [shape: f32[2,32,32], index: 3, kind: output, shape index: {0}]   ;;  %s1428_s4 = inlined_call_operand.vmem [shape: f32[2,2,16,16], index: 4, kind: output, shape index: {1}]  }
   0x1   :  { %12 = vsyncpa [#allocation3 + $0x1], 0 }
   0x2   :  { %13 = vsyncpa [#allocation5], 0  ;;  %s1209_s15 = smov 0   ;;  %s1211_s16 = smov 0  }
   0x3   :  { %s1213_s17 = smov 0   ;;  %s1215_s18 = smov 0  }
   0x4   :  { %s1217_s19 = smov 0   ;;  %s1219_s20 = smov 0  }
   0x5 LB: > { %s861_s21 = sadd.s32 4294967295, %s1178_s20   ;;  %p53_p0 = scmp.ne.s32.totalorder %s1162_s16, %s1158_s15  ;;  %s1178_s20 = sphi %s1219_s20, %s19_s20   ;;  %s1174_s19 = sphi %s1217_s19, %s1445_s19   ;;  %s1170_s18 = sphi %s1215_s18, %s1444_s18   ;;  %s1166_s17 = sphi %s1213_s17, %s1443_s17   ;;  %s1162_s16 = sphi %s1211_s16, %s1442_s16   ;;  %s1158_s15 = sphi %s1209_s15, %s1441_s15  }
   0x6   : > { %p1239_p1 = scmp.eq.s32.totalorder %s861_s21, 0  ;;  %p863_p2 = scmp.ge.s32.totalorder %s1178_s20, 1 }
   0x7   : > { %p162_p3 = scmp.lt.s32.totalorder %s1178_s20, 3  ;;  %s1180_s25 = smov [#allocation4]  }
   0x8   : > { %s1433_s22 = scalar_select %p1239_p1, 1, 0 }
   0x9   : > { %p1247_p4 = por %p1239_p1, %p53_p0  ;;  %p1251_p5 = pnand %p863_p2, %p162_p3 }
   0xa   : > { %s177_s26 = sshll.u32 %s1180_s25, 4  ;;  %s31_s28 = sadd.s32 1, %s1174_s19  ;;  %s178_s26 = int_to_ptr.vmem [resolvable:$true] %s177_s26 }
   0xb   : > { %s1434_s23 = scalar_select %p1247_p4, 1, 0 }
   0xc   : > { %s1435_s24 = scalar_select %p1251_p5, 1, 0 }
   0xd   : > { %p1004_p6 = pneg %p1251_p5  ;;  %s1066_s5 = scalar_lea.hbm %s1426_s2, 512 }
   0xe   : > { %p1067_p8 = scmp.ne.s32.totalorder %s1426_s2, %s1066_s5  ;;  %p1073_p12 = scmp.lt.u32.totalorder %s1066_s5, %s1426_s2 }
   0xf   : > { %p1259_p7 = pnand %p1004_p6, %p1239_p1 }
  0x11   : > { %p1068_p9 = pneg %p1259_p7 }
  0x13   : > { %p1069_p10 = pnand %p1068_p9, %p1067_p8 }
  0x15   : > { %p1070_p11 = pneg %p1069_p10 }
  0x17   : > { %p1075_p13 = pnand %p1073_p12, %p1070_p11 }
  0x19   : > { %1078 = shalt.err (!%p1075_p13)
}
  0x1a   : > { %s1079_s10 = scalar_lea.vmem %s178_s26, 512  ;;  %p1087_p6 = scmp.lt.s32.totalorder %s178_s26, %s178_s26 }
  0x1b   : > { %p1080_p0 = scmp.ne.s32.totalorder %s178_s26, %s1079_s10  ;;  %p1088_p1 = scmp.lt.s32.totalorder %s1079_s10, %s1079_s10 }
  0x1d   : > { %p1082_p2 = pnand %p1080_p0, %p1068_p9  ;;  %p1089_p4 = por %p1088_p1, %p1087_p6 }
  0x1f   : > { %p1083_p3 = pneg %p1082_p2 }
  0x21   : > { %p1090_p5 = pnand %p1089_p4, %p1083_p3 }
  0x23   : > { %1093 = shalt.err (!%p1090_p5)
}
  0x24   : > { %s1181_s11 = smov 128   ;;  %s1182_s12 = smov 8  }
  0x25   : > { %1007 = dma.hbm_to_vmem [thread:$0]  (!%p1259_p7), %s1426_s2, 512, %s178_s26, [#allocation5], %s1181_s11, %s1181_s11, %s1182_s12  }
  0x26   : > { %p33_p1 = scmp.ge.s32.totalorder %s31_s28, 2  ;;  %s40_s15 = sadd.s32 1, %s1166_s17 }
  0x27   : > { %p47_p4 = scmp.ne.s32.totalorder %s1166_s17, %s1162_s16  ;;  %p48_p5 = scmp.eq.s32.totalorder %s1178_s20, 0 }
  0x28   : > { %s1447_s28 = smov (%p33_p1, %s31_s28), 0  ;;  %p1013_p9 = scmp.lt.s32.totalorder %s1178_s20, 2 }
  0x29   : > { %p49_p8 = por %p48_p5, %p47_p4  ;;  %s35_s21 = ssub.s32 %s1174_s19, %s1447_s28 }
  0x2a   : > { %s191_s25 = sand.u32 1, %s1166_s17   ;;  %p38_p10 = scmp.eq.s32.totalorder %s35_s21, 0 }
  0x2b   : > { %s995_s27 = smul.u32 96, %s191_s25  ;;  %p1293_p11 = pnand %p1013_p9, %p49_p8 }
  0x2c   : > { %s1298_s26 = scalar_select %p38_p10, %s1166_s17, %s40_s15  }
  0x2d   : > { %s996_s30 = smul.u32 1536, %s1174_s19  ;;  %s195_s5 = scalar_lea.vmem [#allocation2], %s995_s27 }
  0x2e   : > { %s204_s6 = sshll.u32 %s195_s5, 4  ;;  %s1308_s10 = scalar_lea.sflag [#allocation3], %s191_s25  ;;  %s1306_s6 = int_to_ptr.vmem [resolvable:$true] %s204_s6 }
  0x2f   : > { %s1304_s9 = scalar_lea.hbm %s1424_s0, %s996_s30  ;;  %p1096_p12 = pneg %p1293_p11 }
  0x30   : > { %s1094_s13 = scalar_lea.hbm %s1304_s9, 1536  ;;  %s1099_s21 = scalar_lea.hbm %s1424_s0, 3072 }
  0x31   : > { %p1095_p7 = scmp.ne.s32.totalorder %s1304_s9, %s1094_s13  ;;  %p1100_p2 = scmp.lt.u32.totalorder %s1304_s9, %s1424_s0 }
  0x32   : > { %p1101_p3 = scmp.lt.u32.totalorder %s1099_s21, %s1094_s13  ;;  %p1103_p1 = scmp.lt.u32.totalorder %s1094_s13, %s1304_s9 }
  0x33   : > { %p1097_p13 = pnand %p1096_p12, %p1095_p7 }
  0x34   : > { %p1102_p6 = por %p1101_p3, %p1100_p2 }
  0x35   : > { %p1098_p0 = pneg %p1097_p13 }
  0x36   : > { %p1104_p4 = por %p1103_p1, %p1102_p6 }
  0x38   : > { %p1105_p5 = pnand %p1104_p4, %p1098_p0 }
  0x3a   : > { %1108 = shalt.err (!%p1105_p5)
}
  0x3b   : > { %s1109_s25 = scalar_lea.vmem %s1306_s6, 1536  ;;  %s1183_s5 = smov [#allocation2]  }
  0x3c   : > { %p1110_p8 = scmp.ne.s32.totalorder %s1306_s6, %s1109_s25  ;;  %s1114_s7 = sshll.u32 %s1183_s5, 4  ;;  %s1115_s7 = int_to_ptr.vmem [resolvable:$false] %s1114_s7 }
  0x3d   : > { %s1116_s8 = scalar_lea.vmem %s1115_s7, 3072  ;;  %p1117_p7 = scmp.lt.s32.totalorder %s1306_s6, %s1115_s7 }
  0x3e   : > { %p1112_p9 = pnand %p1110_p8, %p1096_p12  ;;  %p1118_p13 = scmp.lt.s32.totalorder %s1116_s8, %s1109_s25 }
  0x40   : > { %p1113_p10 = pneg %p1112_p9  ;;  %p1119_p2 = por %p1118_p13, %p1117_p7 }
  0x42   : > { %p1120_p3 = pnand %p1119_p2, %p1113_p10 }
  0x44   : > { %1123 = shalt.err (!%p1120_p3)
}
  0x45   : > { %1011 = dma.hbm_to_vmem [thread:$0]  (!%p1293_p11), %s1304_s9, 1536, %s1306_s6, %s1308_s10, %s1181_s11, %s1181_s11, %s1182_s12  }
  0x46   : > { %p1438_p12 = scmp.ne.s32.totalorder %s1435_s24, 0 }
  0x47   : > { %s218_s13 = sand.u32 (!%p1438_p12), 1, %s1162_s16   ;;  %p1439_p0 = scmp.ne.s32.totalorder (!%p1438_p12), %s1434_s23, 0 }
  0x48   : > { %216 = sbr.rel (%p1438_p12) target bundleno = 544 (0x220), region = 32  ;;  %s219_s15 = scalar_lea.sflag (!%p1438_p12), [#allocation3], %s218_s13 }
  0x49   : > { %s997_s14 = smul.u32 (!%p1438_p12), 96, %s218_s13 }
  0x4b   : > { %s1342_s21 = scalar_lea.vmem (!%p1438_p12), [#allocation2], %s997_s14 }
  0x4f   : > { %1149 = dma.done.wait (%p1439_p0), %s219_s15, 1536  }
  0x50   : > { %1151 = vsyncadd (%p1439_p0), %s219_s15, 4294965760  ;;  %p1440_p6 = scmp.ne.s32.totalorder %s1433_s22, 0 }
  0x52   : > { %1153 = dma.done.wait (%p1440_p6), [#allocation5], 512  }
  0x53   : > { %1155 = vsyncadd (%p1440_p6), [#allocation5], 4294966784  ;;  %v285_v0 = vld [vmem:[%s1342_s21] sm:$0xff]  ;;  %v286_v1 = vld [vmem:[%s1342_s21 + $0x8] sm:$0xff]  ;;  %vm323_vm0 = vcmask 261120   ;;  %p266_p11 = scmp.lt.s32.totalorder %s1170_s18, 1 }
  0x54   : > { %v873_v2 = vld [vmem:[%s1342_s21 + $0x20] sm:$0xff]  ;;  %v874_v3 = vld [vmem:[%s1342_s21 + $0x28] sm:$0xff]  ;;  %v299_v6 = vmul.f32 0.1495, %v285_v0  ;;  %v300_v7 = vmul.f32 0.1495, %v286_v1 }
  0x55   : > { %v877_v4 = vld [vmem:[%s1342_s21 + $0x40] sm:$0xff]  ;;  %v878_v5 = vld [vmem:[%s1342_s21 + $0x48] sm:$0xff]  ;;  %v303_v8 = vmul.f32 0.2935, %v873_v2  ;;  %v304_v9 = vmul.f32 0.2935, %v874_v3 }
  0x56   : > { %v311_v10 = vmul.f32 0.057, %v877_v4  ;;  %v312_v11 = vmul.f32 0.057, %v878_v5  ;;  %v328_v12 = vmul.f32 -0.08435, %v285_v0 }
  0x57   : > { %v307_v13 = vadd.f32 %v303_v8, %v299_v6  ;;  %v308_v14 = vadd.f32 %v304_v9, %v300_v7  ;;  %v329_v15 = vmul.f32 -0.08435, %v286_v1  ;;  %v332_v16 = vmul.f32 -0.16565, %v873_v2  ;;  %v287_v17 = vld [vmem:[%s1342_s21 + $0x10] sm:$0xff]  ;;  %v288_v21 = vld [vmem:[%s1342_s21 + $0x18] sm:$0xff] }
  0x58   : > { %v333_v18 = vmul.f32 -0.16565, %v874_v3  ;;  %v340_v19 = vmul.f32 0.25, %v877_v4  ;;  %v341_v20 = vmul.f32 0.25, %v878_v5  ;;  %v875_v22 = vld [vmem:[%s1342_s21 + $0x30] sm:$0xff]  ;;  %v876_v26 = vld [vmem:[%s1342_s21 + $0x38] sm:$0xff] }
  0x59   : > { %v1361_v23 = vadd.f32 %v311_v10, %v307_v13  ;;  %v1363_v24 = vadd.f32 %v312_v11, %v308_v14  ;;  %v336_v25 = vadd.f32 %v332_v16, %v328_v12  ;;  %v879_v27 = vld [vmem:[%s1342_s21 + $0x50] sm:$0xff]  ;;  %v301_v28 = vmul.f32 0.1495, %v287_v17  ;;  %v1370_v29 = vld [vmem:[%s1425_s1] sm:$0xff]  ;;  %v880_v35 = vld [vmem:[%s1342_s21 + $0x58] sm:$0xff]  ;;  %s1449_s18 = smov (!%p266_p11, %s1170_s18), 1 }
  0x5a   : > { %v337_v30 = vadd.f32 %v333_v18, %v329_v15  ;;  %v302_v31 = vmul.f32 0.1495, %v288_v21  ;;  %v305_v32 = vmul.f32 0.2935, %v875_v22  ;;  %v306_v33 = vmul.f32 0.2935, %v876_v26  ;;  %927 = vmatprep.mubr.msk.f32.mxu0 %vm323_vm0, %v1370_v29 }
  0x5b   : > { %v344_v34 = vadd.f32 %v340_v19, %v336_v25  ;;  %v313_v36 = vmul.f32 0.057, %v879_v27  ;;  %v352_v37 = vmul.f32 0.25, %v285_v0  ;;  %v314_v41 = vmul.f32 0.057, %v880_v35  ;;  %v378_v60 = vld [vmem:[#allocation4] sm:$0xff] }
  0x5c   : > { %v345_v38 = vadd.f32 %v341_v20, %v337_v30  ;;  %v309_v39 = vadd.f32 %v305_v32, %v301_v28  ;;  %v310_v40 = vadd.f32 %v306_v33, %v302_v31  ;;  %v330_v43 = vmul.f32 -0.08435, %v287_v17  ;;  %v379_v61 = vld [vmem:[#allocation4 + $0x8] sm:$0xff]  ;;  %s893_s12 = sshll.u32 %s1449_s18, 5 }
  0x5d   : > { %v348_v42 = vadd.f32 0.5, %v344_v34  ;;  %v331_v44 = vmul.f32 -0.08435, %v288_v21  ;;  %v342_v45 = vmul.f32 0.25, %v879_v27  ;;  %v334_v49 = vmul.f32 -0.16565, %v875_v22  ;;  %s273_s9 = scalar_lea.vmem %s1427_s3, %s893_s12  ;;  %s283_s27 = scalar_lea.vmem %s1428_s4, %s893_s12 }
  0x5e   : > { %v349_v46 = vadd.f32 0.5, %v345_v38  ;;  %v1375_v47 = vadd.f32 %v313_v36, %v309_v39  ;;  %v1377_v48 = vadd.f32 %v314_v41, %v310_v40  ;;  %v335_v50 = vmul.f32 -0.16565, %v876_v26 }
  0x5f   : > { %v343_v51 = vmul.f32 0.25, %v880_v35  ;;  %v353_v52 = vmul.f32 0.25, %v286_v1  ;;  %v356_v53 = vmul.f32 -0.20935, %v873_v2  ;;  %v338_v55 = vadd.f32 %v334_v49, %v330_v43  ;;  %v380_v1 = vld [vmem:[#allocation4 + $0x10] sm:$0xff]  ;;  %v381_v2 = vld [vmem:[#allocation4 + $0x18] sm:$0xff] }
  0x60   : > { %v963_v54 = vpack.c.bf16 %v349_v46, %v348_v42  ;;  %v339_v56 = vadd.f32 %v335_v50, %v331_v44  ;;  %v357_v57 = vmul.f32 -0.20935, %v874_v3  ;;  %v364_v59 = vmul.f32 -0.04065, %v877_v4 }
  0x61   : > { %v360_v58 = vadd.f32 %v356_v53, %v352_v37  ;;  %v346_v62 = vadd.f32 %v342_v45, %v338_v55  ;;  %v365_v63 = vmul.f32 -0.04065, %v878_v5  ;;  %v354_v0 = vmul.f32 0.25, %v287_v17 }
  0x62   : > { %964 = vmatprep.subr.bf16.mxu0 %v963_v54  ;;  %v355_v6 = vmul.f32 0.25, %v288_v21  ;;  %v347_v7 = vadd.f32 %v343_v51, %v339_v56  ;;  %v361_v8 = vadd.f32 %v357_v57, %v353_v52  ;;  %v358_v10 = vmul.f32 -0.20935, %v875_v22 }
  0x63   : > { %966 = vmatpush3.bf16.msra.mxu0 %v963_v54  ;;  %v368_v9 = vadd.f32 %v364_v59, %v360_v58  ;;  %v350_v11 = vadd.f32 0.5, %v346_v62  ;;  %v359_v12 = vmul.f32 -0.20935, %v876_v26  ;;  %v366_v13 = vmul.f32 -0.04065, %v879_v27  ;;  %v377_v27 = vld [vmem:[%s1425_s1 + $0x8] sm:$0xff] }
  0x64   : > { %v971_v3 = vpack.c.bf16 %v379_v61, %v378_v60  ;;  %v351_v14 = vadd.f32 0.5, %v347_v7  ;;  %v369_v4 = vadd.f32 %v365_v63, %v361_v8  ;;  %v362_v16 = vadd.f32 %v358_v10, %v354_v0 }
  0x65   : > { %v372_v15 = vadd.f32 0.5, %v368_v9  ;;  %v363_v18 = vadd.f32 %v359_v12, %v355_v6  ;;  %v367_v19 = vmul.f32 -0.04065, %v880_v35  ;;  %v975_v5 = vpack.c.bf16 %v381_v2, %v380_v1 }
  0x66   : > { %972 = vmatprep.subr.bf16.mxu1 %v971_v3  ;;  %v967_v17 = vpack.c.bf16 %v351_v14, %v350_v11  ;;  %v373_v20 = vadd.f32 0.5, %v369_v4  ;;  %v370_v21 = vadd.f32 %v366_v13, %v362_v16  ;;  %v319_v31 = vadd.f32 0.5, %v1361_v23 }
  0x67   : > { %974 = vmatpush3.bf16.msra.mxu1 %v971_v3  ;;  %v371_v25 = vadd.f32 %v367_v19, %v363_v18  ;;  %v320_v32 = vadd.f32 0.5, %v1363_v24  ;;  %v321_v33 = vadd.f32 0.5, %v1375_v47  ;;  %v322_v34 = vadd.f32 0.5, %v1377_v48 }
  0x68   : > { %976 = vmatprep.subr.bf16.mxu1 %v975_v5  ;;  %968 = vmatprep.subr.bf16.mxu0 %v967_v17  ;;  %v979_v22 = vpack.c.bf16 %v373_v20, %v372_v15  ;;  %v374_v26 = vadd.f32 0.5, %v370_v21  ;;  %324 = vst.msk [vmem:[%s273_s9] sm:$0xff] %vm323_vm0, %v319_v31  ;;  %vm544_vm1 = vcmask 130048  }
  0x69   : > { %970 = vmatpush3.bf16.msra.mxu0 %v967_v17  ;;  %v375_v28 = vadd.f32 0.5, %v371_v25  ;;  %325 = vst.msk [vmem:[%s273_s9 + $0x8] sm:$0xff] %vm323_vm0, %v320_v32  ;;  %326 = vst.msk [vmem:[%s273_s9 + $0x10] sm:$0xff] %vm323_vm0, %v321_v33 }
  0x6a   : > { %980 = vmatprep.subr.bf16.mxu0 %v979_v22  ;;  %327 = vst.msk [vmem:[%s273_s9 + $0x18] sm:$0xff] %vm323_vm0, %v322_v34 }
  0x6b   : > { %978 = vmatpush3.bf16.msra.mxu1 %v975_v5  ;;  %v983_v30 = vpack.c.bf16 %v375_v28, %v374_v26 }
  0x6c   : > { %988 = vmatprep.subr.bf16.mxu1 %v971_v3  ;;  %928 = vmatmul.mubr.msk.f32.vlgmr.msra.gmra.mrb[0].mxu0 %vm323_vm0, %v377_v27 }
  0x6d   : > { %982 = vmatpush3.bf16.msra.mxu0 %v979_v22  ;;  %949 = vmatprep.mubr.msk.f32.mxu0 %vm323_vm0, %v1370_v29 }
  0x6e   : > { %984 = vmatprep.subr.bf16.mxu0 %v983_v30 }
  0x71   : > { %986 = vmatpush3.bf16.msra.mxu0 %v983_v30 }
  0x74   : > { %950 = vmatmul.mubr.msk.f32.vlgmr.msra.gmra.mrb[2].mxu0 %vm323_vm0, %v377_v27 }
 0x13f   : > { %v929_v23 = vpop.f32.mrb[0].mxu0 }
 0x140   : > { %v454_v24 = vpop.f32.mrb[1].mxu0 }
 0x141   : > { %938 = vmatprep.mubr.msk.f32.mxu1 %vm323_vm0, %v454_v24 }
 0x142   : > { %939 = vmatmul.mubr.msk.f32.vlgmr.msra.gmra.mrb[0].mxu1 %vm323_vm0, %v929_v23 }
 0x143   : > { %990 = vmatpush3.bf16.msra.mxu1 %v971_v3 }
 0x144   : > { %992 = vmatprep.subr.bf16.mxu1 %v975_v5 }
 0x147   : > { %v951_v29 = vpop.f32.mrb[2].mxu0  ;;  %994 = vmatpush3.bf16.msra.mxu1 %v975_v5 }
 0x148   : > { %v613_v35 = vpop.f32.mrb[3].mxu0 }
 0x149   : > { %960 = vmatprep.mubr.msk.f32.mxu1 %vm323_vm0, %v613_v35 }
 0x14a   : > { %961 = vmatmul.mubr.msk.f32.vlgmr.msra.gmra.mrb[2].mxu1 %vm323_vm0, %v951_v29 }
 0x215   : > { %v940_v36 = vpop.f32.mrb[0].mxu1 }
 0x216   : > { %546 = vst.msk [vmem:[%s283_s27 + $0x8] sm:$0xff] %vm544_vm1, %v940_v36  ;;  %v535_v37 = vpop.f32.mrb[1].mxu1 }
 0x217   : > { %545 = vst.msk [vmem:[%s283_s27] sm:$0xff] %vm544_vm1, %v535_v37 }
 0x21d   : > { %v962_v38 = vpop.f32.mrb[2].mxu1 }
 0x21e   : > { %890 = vst.msk [vmem:[%s283_s27 + $0x18] sm:$0xff] %vm544_vm1, %v962_v38  ;;  %v694_v39 = vpop.f32.mrb[3].mxu1 }
 0x21f   : > { %889 = vst.msk [vmem:[%s283_s27 + $0x10] sm:$0xff] %vm544_vm1, %v694_v39 }
 0x220 PF: > { %s19_s20 = sadd.s32 1, %s1178_s20   ;;  %s1441_s15 = smov %s1162_s16 }
 0x221   : > { %p16_p1 = scmp.ge.s32.totalorder %s19_s20, 4   ;;  %s1442_s16 = smov %s1166_s17 }
 0x222   : > { %s1443_s17 = smov %s1298_s26  ;;  %s1444_s18 = smov %s1174_s19 }
 0x223   : > { %s1445_s19 = smov %s1447_s28  ;;  %18 = sbr.rel (!%p16_p1) target bundleno = 5 (0x5), region = 91 }
 0x22a   :  { %761 = vsyncpa [#allocation3], 1 }
 0x22b   :  { %763 = vsyncpa [#allocation3 + $0x1], 1 }
 0x22c   :  { %764 = vsyncpa [#allocation5], 1 }

// kernel: dct_forward.7
= control target key start
LH: loop header
LB: loop body
LE: loop exit
PB: predicated region body
PF: predicated region fallthrough
CT: control target
= control target key end

     0   :  { %9 = vsyncpa [#allocation3], 0  ;;  %s1324_s0 = inlined_call_operand.vmem [shape: f32[2,32,32], index: 0, kind: input, shape index: {}]   ;;  %s1325_s1 = inlined_call_operand.vmem [shape: f32[2,2,16,16], index: 1, kind: input, shape index: {}]   ;;  %s1326_s2 = inlined_call_operand.vmem [shape: f32[32,16], index: 2, kind: input, shape index: {}]   ;;  %s1327_s3 = inlined_call_operand.vmem [shape: f32[16,32], index: 3, kind: input, shape index: {}]   ;;  %s1328_s4 = inlined_call_operand.hbm [shape: f32[2,3,32,32], index: 4, kind: output, shape index: {}]  }
   0x1   :  { %11 = vsyncpa [#allocation3 + $0x1], 0  ;;  %s1134_s15 = smov 0   ;;  %s1136_s16 = smov 0  }
   0x2   :  { %s1138_s17 = smov 0   ;;  %s1140_s18 = smov 0  }
   0x3   :  { %s1142_s19 = smov 0   ;;  %s1144_s20 = smov 0  }
   0x4 LB: > { %s846_s21 = sadd.s32 4294967295, %s1104_s20   ;;  %s847_s22 = sadd.s32 4294967294, %s1104_s20   ;;  %s1104_s20 = sphi %s1144_s20, %s17_s20   ;;  %s1100_s19 = sphi %s1142_s19, %s1335_s19   ;;  %s1096_s18 = sphi %s1140_s18, %s1334_s18   ;;  %s1092_s17 = sphi %s1138_s17, %s1333_s17   ;;  %s1088_s16 = sphi %s1136_s16, %s1332_s16   ;;  %s1084_s15 = sphi %s1134_s15, %s1331_s15  }
   0x5   : > { %s29_s23 = sadd.s32 1, %s1100_s19  ;;  %s139_s24 = sadd.s32 1, %s1092_s17 }
   0x6   : > { %p31_p0 = scmp.ge.s32.totalorder %s29_s23, 2  ;;  %p149_p1 = scmp.ne.s32.totalorder %s1092_s17, %s1088_s16 }
   0x7   : > { %p150_p2 = scmp.eq.s32.totalorder %s846_s21, 1  ;;  %p155_p3 = scmp.ne.s32.totalorder %s1088_s16, %s1084_s15 }
   0x8   : > { %s1337_s23 = smov (%p31_p0, %s29_s23), 0  ;;  %p156_p5 = scmp.eq.s32.totalorder %s847_s22, 1 }
   0x9   : > { %p1174_p4 = por %p150_p2, %p149_p1  ;;  %s134_s26 = ssub.s32 %s1100_s19, %s1337_s23 }
   0xa   : > { %p851_p6 = scmp.ge.s32.totalorder %s1104_s20, 1  ;;  %p137_p7 = scmp.eq.s32.totalorder %s134_s26, 0 }
   0xb   : > { %p1181_p8 = por %p156_p5, %p155_p3  ;;  %p207_p9 = scmp.lt.s32.totalorder %s1104_s20, 3 }
   0xc   : > { %s1187_s28 = scalar_select %p137_p7, %s1092_s17, %s139_s24  }
   0xd   : > { %p208_p10 = pnand %p851_p6, %p207_p9 }
   0xe   : > { %p248_p11 = scmp.lt.s32.totalorder (!%p208_p10), %s1096_s18, 1  ;;  %v269_v0 = vld [vmem:[%s1326_s2] sm:$0xff] (!%p208_p10)  ;;  %vm277_vm0 = vcmask (!%p208_p10), 130048   ;;  %v274_v2 = vld [vmem:[%s1327_s3 + $0x8] sm:$0xff] (!%p208_p10)  ;;  %v271_v11 = vld [vmem:[%s1326_s2 + $0x10] sm:$0xff] (!%p208_p10)  ;;  %s244_s7 = sand.u32 (!%p208_p10), 1, %s1088_s16  }
   0xf   : > { %211 = sbr.rel (%p208_p10) target bundleno = 495 (0x1ef), region = 36  ;;  %915 = vmatprep.mubr.msk.f32.mxu0 (!%p208_p10), %vm277_vm0, %v269_v0  ;;  %v273_v1 = vld [vmem:[%s1327_s3] sm:$0xff] (!%p208_p10)  ;;  %v270_v10 = vld [vmem:[%s1326_s2 + $0x8] sm:$0xff] (!%p208_p10)  ;;  %v272_v12 = vld [vmem:[%s1326_s2 + $0x18] sm:$0xff] (!%p208_p10)  ;;  %vm677_vm1 = vcmask (!%p208_p10), 261120   ;;  %s1278_s14 = scalar_lea.sflag (!%p208_p10), [#allocation3], %s244_s7 }
  0x10   : > { %v955_v3 = vpack.c.bf16 (!%p208_p10), %v274_v2, %v273_v1  ;;  %s967_s8 = smul.u32 (!%p208_p10), 96, %s244_s7  ;;  %s1106_s22 = smov (!%p208_p10), [#allocation2]  }
  0x11   : > { %s1030_s24 = sshll.u32 (!%p208_p10), %s1106_s22, 4  ;;  %s1031_s24 = int_to_ptr.vmem [resolvable:$false] %s1030_s24 }
  0x12   : > { %956 = vmatprep.subr.bf16.mxu1 (!%p208_p10), %v955_v3  ;;  %s1032_s26 = scalar_lea.vmem (!%p208_p10), %s1031_s24, 3072 }
  0x13   : > { %958 = vmatpush3.bf16.msra.mxu1 (!%p208_p10), %v955_v3 }
  0x14   : > { %964 = vmatprep.subr.bf16.mxu1 (!%p208_p10), %v955_v3 }
  0x16   : > { %s1201_s9 = scalar_select %p248_p11, %s1096_s18, 1 }
  0x18   : > { %s885_s10 = sshll.u32 %s1201_s9, 5  ;;  %s1241_s9 = scalar_lea.vmem [#allocation2], %s967_s8 }
  0x19   : > { %s261_s13 = scalar_lea.vmem %s1325_s1, %s885_s10  ;;  %s255_s6 = scalar_lea.vmem %s1324_s0, %s885_s10 }
  0x1a   : > { %v275_v4 = vld [vmem:[%s261_s13] sm:$0xff]  ;;  %v276_v5 = vld [vmem:[%s261_s13 + $0x8] sm:$0xff]  ;;  %v864_v6 = vld [vmem:[%s261_s13 + $0x10] sm:$0xff]  ;;  %s968_s10 = smul.u32 1536, %s1096_s18  ;;  %s740_s11 = sshll.u32 %s1241_s9, 4  ;;  %s1270_s11 = int_to_ptr.vmem [resolvable:$true] %s740_s11 }
  0x1b   : > { %v951_v7 = vpack.c.bf16 %v276_v5, %v275_v4  ;;  %v865_v8 = vld [vmem:[%s261_s13 + $0x18] sm:$0xff]  ;;  %v658_v21 = vld [vmem:[%s255_s6 + $0x8] sm:$0xff]  ;;  %v657_v22 = vld [vmem:[%s255_s6] sm:$0xff]  ;;  %s1026_s21 = scalar_lea.vmem %s1270_s11, 1536  ;;  %p1033_p1 = scmp.lt.s32.totalorder %s1270_s11, %s1031_s24 }
  0x1c   : > { %v959_v9 = vpack.c.bf16 %v865_v8, %v864_v6  ;;  %v662_v23 = vmul.f32 2.0, %v658_v21  ;;  %v661_v25 = vmul.f32 2.0, %v657_v22  ;;  %v660_v26 = vld [vmem:[%s255_s6 + $0x18] sm:$0xff]  ;;  %v659_v30 = vld [vmem:[%s255_s6 + $0x10] sm:$0xff]  ;;  %s1268_s13 = scalar_lea.hbm %s1328_s4, %s968_s10  ;;  %p1027_p12 = scmp.ne.s32.totalorder %s1270_s11, %s1026_s21 }
  0x1d   : > { %952 = vmatprep.subr.bf16.mxu0 %v951_v7  ;;  %v664_v35 = vmul.f32 2.0, %v660_v26  ;;  %v663_v39 = vmul.f32 2.0, %v659_v30  ;;  %p1034_p2 = scmp.lt.s32.totalorder %s1032_s26, %s1026_s21 }
  0x1e   : > { %954 = vmatpush3.bf16.msra.mxu0 %v951_v7  ;;  %p1028_p13 = pnand %p1027_p12, %p1174_p4 }
  0x1f   : > { %960 = vmatprep.subr.bf16.mxu0 %v959_v9  ;;  %p1035_p3 = por %p1034_p2, %p1033_p1 }
  0x20   : > { %p1029_p0 = pneg %p1028_p13 }
  0x21   : > { %916 = vmatmul.mubr.msk.f32.vlgmr.msra.gmra.mrb[0].mxu0 %vm277_vm0, %v270_v10 }
  0x22   : > { %962 = vmatpush3.bf16.msra.mxu0 %v959_v9  ;;  %918 = vmatprep.mubr.msk.f32.mxu0 %vm277_vm0, %v271_v11  ;;  %p1036_p5 = pnand %p1035_p3, %p1029_p0 }
  0x25   : > { %919 = vmatmul.mubr.msk.f32.gmra.mrb[2].mxu0 %vm277_vm0, %v272_v12 }
  0x26   : > { %935 = vmatprep.mubr.msk.f32.mxu0 %vm277_vm0, %v269_v0 }
  0x29   : > { %936 = vmatmul.mubr.msk.f32.vlgmr.msra.gmra.mrb[4].mxu0 %vm277_vm0, %v270_v10 }
  0x2a   : > { %938 = vmatprep.mubr.msk.f32.mxu0 %vm277_vm0, %v271_v11 }
  0x2d   : > { %939 = vmatmul.mubr.msk.f32.gmra.mrb[6].mxu0 %vm277_vm0, %v272_v12 }
  0xf4   : > { %v917_v13 = vpop.f32.mrb[0].mxu0 }
  0xf5   : > { %v356_v14 = vpop.f32.mrb[1].mxu0 }
  0xf6   : > { %925 = vmatprep.mubr.msk.f32.mxu1 %vm277_vm0, %v356_v14 }
  0xf7   : > { %926 = vmatmul.mubr.msk.f32.vlgmr.msra.gmra.mrb[0].mxu1 %vm277_vm0, %v917_v13 }
  0xf8   : > { %v920_v15 = vpop.f32.mrb[2].mxu0  ;;  %966 = vmatpush3.bf16.msra.mxu1 %v955_v3 }
  0xf9   : > { %v366_v16 = vpop.f32.mrb[3].mxu0 }
  0xfa   : > { %928 = vmatprep.mubr.msk.f32.mxu1 %vm277_vm0, %v366_v16 }
  0xfb   : > { %929 = vmatmul.mubr.msk.f32.gmra.mrb[2].mxu1 %vm277_vm0, %v920_v15 }
  0xfc   : > { %v937_v17 = vpop.f32.mrb[4].mxu0 }
  0xfd   : > { %v541_v18 = vpop.f32.mrb[5].mxu0 }
  0xfe   : > { %945 = vmatprep.mubr.msk.f32.mxu1 %vm277_vm0, %v541_v18 }
  0xff   : > { %946 = vmatmul.mubr.msk.f32.vlgmr.msra.gmra.mrb[4].mxu1 %vm277_vm0, %v937_v17 }
 0x100   : > { %v940_v19 = vpop.f32.mrb[6].mxu0 }
 0x101   : > { %v551_v20 = vpop.f32.mrb[7].mxu0 }
 0x102   : > { %948 = vmatprep.mubr.msk.f32.mxu1 %vm277_vm0, %v551_v20 }
 0x103   : > { %949 = vmatmul.mubr.msk.f32.gmra.mrb[6].mxu1 %vm277_vm0, %v940_v19 }
 0x1ca   : > { %v927_v24 = vpop.f32.mrb[0].mxu1 }
 0x1cb   : > { %v683_v27 = vmul.f32 0.6882726, %v927_v24  ;;  %v708_v28 = vmul.f32 3.544, %v927_v24  ;;  %v453_v29 = vpop.f32.mrb[1].mxu1 }
 0x1cc   : > { %v682_v31 = vmul.f32 0.6882726, %v453_v29  ;;  %v707_v32 = vmul.f32 3.544, %v453_v29 }
 0x1cd   : > { %v687_v33 = vsub.f32 %v662_v23, %v683_v27  ;;  %v712_v34 = vadd.f32 %v708_v28, %v662_v23 }
 0x1ce   : > { %v686_v36 = vsub.f32 %v661_v25, %v682_v31  ;;  %v711_v37 = vadd.f32 %v707_v32, %v661_v25  ;;  %v930_v38 = vpop.f32.mrb[2].mxu1 }
 0x1cf   : > { %v716_v40 = vadd.f32 -2.772, %v712_v34  ;;  %v685_v41 = vmul.f32 0.6882726, %v930_v38  ;;  %v710_v42 = vmul.f32 3.544, %v930_v38 }
 0x1d0   : > { %v715_v43 = vadd.f32 -2.772, %v711_v37  ;;  %v463_v44 = vpop.f32.mrb[3].mxu1 }
 0x1d1   : > { %879 = vst.msk [vmem:[%s1241_s9 + $0x48] sm:$0xff] %vm677_vm1, %v716_v40  ;;  %v689_v45 = vsub.f32 %v664_v35, %v685_v41  ;;  %v714_v46 = vadd.f32 %v710_v42, %v664_v35  ;;  %v684_v47 = vmul.f32 0.6882726, %v463_v44  ;;  %v709_v48 = vmul.f32 3.544, %v463_v44 }
 0x1d2   : > { %878 = vst.msk [vmem:[%s1241_s9 + $0x40] sm:$0xff] %vm677_vm1, %v715_v43  ;;  %v947_v49 = vpop.f32.mrb[4].mxu1 }
 0x1d3   : > { %v718_v50 = vadd.f32 -2.772, %v714_v46  ;;  %v688_v51 = vsub.f32 %v663_v39, %v684_v47  ;;  %v713_v52 = vadd.f32 %v709_v48, %v663_v39  ;;  %v666_v53 = vmul.f32 2.804, %v947_v49  ;;  %v638_v54 = vpop.f32.mrb[5].mxu1 }
 0x1d4   : > { %v691_v55 = vmul.f32 1.4282726, %v947_v49  ;;  %v665_v56 = vmul.f32 2.804, %v638_v54  ;;  %v690_v57 = vmul.f32 1.4282726, %v638_v54 }
 0x1d5   : > { %881 = vst.msk [vmem:[%s1241_s9 + $0x58] sm:$0xff] %vm677_vm1, %v718_v50  ;;  %v717_v58 = vadd.f32 -2.772, %v713_v52  ;;  %v670_v59 = vadd.f32 %v666_v53, %v662_v23 }
 0x1d6   : > { %v695_v60 = vsub.f32 %v687_v33, %v691_v55  ;;  %v669_v61 = vadd.f32 %v665_v56, %v661_v25  ;;  %v694_v62 = vsub.f32 %v686_v36, %v690_v57  ;;  %v950_v63 = vpop.f32.mrb[6].mxu1 }
 0x1d7   : > { %880 = vst.msk [vmem:[%s1241_s9 + $0x50] sm:$0xff] %vm677_vm1, %v717_v58  ;;  %v674_v0 = vadd.f32 -2.402, %v670_v59  ;;  %v668_v1 = vmul.f32 2.804, %v950_v63 }
 0x1d8   : > { %v693_v2 = vmul.f32 1.4282726, %v950_v63  ;;  %v699_v3 = vadd.f32 0.05827257, %v695_v60  ;;  %v673_v4 = vadd.f32 -2.402, %v669_v61 }
 0x1d9   : > { %v698_v5 = vadd.f32 0.05827257, %v694_v62  ;;  %679 = vst.msk [vmem:[%s1241_s9 + $0x8] sm:$0xff] %vm677_vm1, %v674_v0  ;;  %v672_v6 = vadd.f32 %v668_v1, %v664_v35  ;;  %v648_v8 = vpop.f32.mrb[7].mxu1 }
 0x1da   : > { %v697_v7 = vsub.f32 %v689_v45, %v693_v2  ;;  %875 = vst.msk [vmem:[%s1241_s9 + $0x28] sm:$0xff] %vm677_vm1, %v699_v3  ;;  %678 = vst.msk [vmem:[%s1241_s9] sm:$0xff] %vm677_vm1, %v673_v4  ;;  %v667_v9 = vmul.f32 2.804, %v648_v8  ;;  %v692_v10 = vmul.f32 1.4282726, %v648_v8 }
 0x1db   : > { %874 = vst.msk [vmem:[%s1241_s9 + $0x20] sm:$0xff] %vm677_vm1, %v698_v5  ;;  %v676_v11 = vadd.f32 -2.402, %v672_v6 }
 0x1dc   : > { %v701_v12 = vadd.f32 0.05827257, %v697_v7  ;;  %v671_v13 = vadd.f32 %v667_v9, %v663_v39  ;;  %v696_v14 = vsub.f32 %v688_v51, %v692_v10 }
 0x1dd   : > { %681 = vst.msk [vmem:[%s1241_s9 + $0x18] sm:$0xff] %vm677_vm1, %v676_v11 }
 0x1de   : > { %877 = vst.msk [vmem:[%s1241_s9 + $0x38] sm:$0xff] %vm677_vm1, %v701_v12  ;;  %v675_v15 = vadd.f32 -2.402, %v671_v13  ;;  %v700_v16 = vadd.f32 0.05827257, %v696_v14 }
 0x1e0   : > { %680 = vst.msk [vmem:[%s1241_s9 + $0x10] sm:$0xff] %vm677_vm1, %v675_v15  ;;  %876 = vst.msk [vmem:[%s1241_s9 + $0x30] sm:$0xff] %vm677_vm1, %v700_v16 }
 0x1e1   : > { %1039 = shalt.err (!%p1036_p5)
}
 0x1e2   : > { %s1040_s29 = scalar_lea.hbm %s1268_s13, 1536  ;;  %s1044_s6 = scalar_lea.hbm %s1328_s4, 3072 }
 0x1e3   : > { %p1041_p6 = scmp.ne.s32.totalorder %s1268_s13, %s1040_s29  ;;  %p1045_p10 = scmp.lt.u32.totalorder %s1268_s13, %s1328_s4 }
 0x1e4   : > { %p1046_p11 = scmp.lt.u32.totalorder %s1044_s6, %s1040_s29  ;;  %p1048_p13 = scmp.lt.u32.totalorder %s1040_s29, %s1268_s13 }
 0x1e5   : > { %p1042_p7 = pnand %p1041_p6, %p1174_p4 }
 0x1e6   : > { %p1047_p12 = por %p1046_p11, %p1045_p10 }
 0x1e7   : > { %p1043_p9 = pneg %p1042_p7 }
 0x1e8   : > { %p1049_p0 = por %p1048_p13, %p1047_p12 }
 0x1ea   : > { %p1050_p1 = pnand %p1049_p0, %p1043_p9 }
 0x1ec   : > { %1053 = shalt.err (!%p1050_p1)
}
 0x1ed   : > { %s1107_s9 = smov 128   ;;  %s1108_s10 = smov 8  }
 0x1ee   : > { %969 = dma.vmem_to_hbm [thread:$0]  (%p1174_p4), %s1270_s11, 1536, %s1268_s13, %s1278_s14, %s1107_s9, %s1107_s9, %s1108_s10  }
 0x1ef PF: > { %p975_p2 = scmp.ge.s32.totalorder %s1104_s20, 2  ;;  %s755_s18 = sand.u32 1, %s1084_s15  }
 0x1f0   : > { %s756_s12 = scalar_lea.sflag [#allocation3], %s755_s18 }
 0x1f1   : > { %p972_p3 = pnand %p975_p2, %p1181_p8 }
 0x1f3   : > { %1079 = dma.done.wait (!%p972_p3), %s756_s12, 1536  }
 0x1f4   : > { %1081 = vsyncadd (!%p972_p3), %s756_s12, 4294965760  ;;  %s17_s20 = sadd.s32 1, %s1104_s20   ;;  %s1331_s15 = smov %s1088_s16 }
 0x1f5   : > { %p14_p5 = scmp.ge.s32.totalorder %s17_s20, 4   ;;  %s1332_s16 = smov %s1092_s17 }
 0x1f6   : > { %s1333_s17 = smov %s1187_s28  ;;  %s1334_s18 = smov %s1100_s19 }
 0x1f7   : > { %s1335_s19 = smov %s1337_s23  ;;  %16 = sbr.rel (!%p14_p5) target bundleno = 4 (0x4), region = 80 }
 0x1fe   :  { %761 = vsyncpa [#allocation3], 1 }
 0x1ff   :  { %763 = vsyncpa [#allocation3 + $0x1], 1 }

</bundles_post_ra>
